<compile_context>
chip_gen: v7x
topology: tpu7x:2x2x1
jax: 0.10.0
libtpu: 0.0.40
codegen_flags: <defaults>
</compile_context>

<pallas_src>
import functools
import math

import jax
import jax.numpy as jnp
from jax.experimental import pallas as pl
from jax.experimental.pallas import tpu as pltpu

_HID = 128  # padded hidden width (lane-dense)


def _autoencoder_kernel(x_ref, wf_ref, wm_ref, wl_ref, bm_ref, bl_ref, out_ref):
    """Fused encoder+decoder MLP.

    x_ref : (tile, in_dim)        compute dtype (bf16 or f32)
    wf_ref: (in_dim, 128)         layer 1 weight
    wm_ref: (6, 128, 128)         layers 2..7 weights, zero-padded
    wl_ref: (128, in_dim)         layer 8 weight
    bm_ref: (7, 128)   f32        biases of layers 1..7, zero-padded
    bl_ref: (1, in_dim) f32       layer 8 bias
    """
    f32 = jnp.float32
    cdt = wf_ref.dtype  # MXU operand dtype

    x = x_ref[...].astype(cdt)

    # ----- layer 1: in_dim -> 128, ReLU -----
    h = jnp.dot(x, wf_ref[...], preferred_element_type=f32) + bm_ref[0:1, :]
    h = jnp.maximum(h, 0.0)

    # ----- layers 2..7 (padded 128x128): encoder 128->64->16->code, decoder code->16->64->128
    # Logical layer 4 (the code/bottleneck) has no activation; all others use ReLU.
    for i in range(6):
        layer = i + 2
        h = jnp.dot(h.astype(cdt), wm_ref[i], preferred_element_type=f32) \
            + bm_ref[layer - 1:layer, :]
        if layer != 4:
            h = jnp.maximum(h, 0.0)

    # ----- layer 8: 128 -> in_dim, Tanh -----
    y = jnp.dot(h.astype(cdt), wl_ref[...], preferred_element_type=f32) + bl_ref[...]
    out_ref[...] = jnp.tanh(y).astype(out_ref.dtype)


def pack_params(params):
    """Pack the 8 (W, b) pairs (logical PyTorch shapes, W stored transposed as
    (in_features, out_features)) into the padded slabs the kernel expects."""
    w_first = params[0][0]                       # (in_dim, 128)
    w_last = params[7][0]                        # (128, in_dim)

    slab = []
    for i in range(1, 7):                        # layers 2..7
        w, _ = params[i]
        fi, fo = w.shape
        wp = jnp.zeros((_HID, _HID), jnp.float32).at[:fi, :fo].set(w)
        slab.append(wp)
    w_slab = jnp.stack(slab)                     # (6, 128, 128)

    b_slab = jnp.zeros((7, _HID), jnp.float32)
    for i in range(7):                           # layers 1..7
        b = params[i][1]
        b_slab = b_slab.at[i, : b.shape[0]].set(b)

    b_last = params[7][1].reshape(1, -1)         # (1, in_dim)
    return (w_first, w_slab, w_last, b_slab, b_last)


@functools.partial(jax.jit, static_argnames=("batch_tile", "compute_dtype"))
def autoencoder_forward(x, packed, *, batch_tile=256, compute_dtype=jnp.bfloat16):
    w_first, w_slab, w_last, b_slab, b_last = packed
    B, in_dim = x.shape
    out_dtype = x.dtype

    # Pad ragged batches up to a multiple of the tile.
    grid_b = pl.cdiv(B, batch_tile)
    Bp = grid_b * batch_tile
    xp = x if Bp == B else jnp.pad(x, ((0, Bp - B), (0, 0)))

    # MXU operands in compute_dtype (bf16 halves HBM traffic + uses native MXU path).
    xp = xp.astype(compute_dtype)
    w_first = w_first.astype(compute_dtype)
    w_slab = w_slab.astype(compute_dtype)
    w_last = w_last.astype(compute_dtype)

    def full_spec(a):
        nd = a.ndim
        return pl.BlockSpec(a.shape, lambda i, _nd=nd: (0,) * _nd)

    param_bytes = sum(int(a.size) * a.dtype.itemsize
                      for a in (w_first, w_slab, w_last, b_slab, b_last))
    flops = 2 * Bp * (in_dim * _HID + 6 * _HID * _HID + _HID * in_dim)
    cost = pl.CostEstimate(
        flops=flops,
        transcendentals=Bp * in_dim,                       # tanh
        bytes_accessed=Bp * in_dim * (xp.dtype.itemsize + out_dtype.itemsize)
        + param_bytes,
    )

    out = pl.pallas_call(
        _autoencoder_kernel,
        out_shape=jax.ShapeDtypeStruct((Bp, in_dim), out_dtype),
        grid=(grid_b,),
        in_specs=[
            pl.BlockSpec((batch_tile, in_dim), lambda i: (i, 0)),
            full_spec(w_first),
            full_spec(w_slab),
            full_spec(w_last),
            full_spec(b_slab),
            full_spec(b_last),
        ],
        out_specs=pl.BlockSpec((batch_tile, in_dim), lambda i: (i, 0)),
        compiler_params=pltpu.CompilerParams(
            dimension_semantics=("parallel",),
            vmem_limit_bytes=64 * 1024 * 1024,
        ),
        cost_estimate=cost,
    )(xp, w_first, w_slab, w_last, b_slab, b_last)

    if Bp != B:
        out = out[:B]
    return out


def init_params(key, in_dim, code_dim):
    """PyTorch-style Kaiming-uniform Linear init.

    Each Linear(in_f, out_f): W ~ U(-1/sqrt(in_f), 1/sqrt(in_f)), same for b.
    Stored as (W.T of shape (in_f, out_f), b of shape (out_f,)).
    """
    dims = [
        (in_dim, 128), (128, 64), (64, 16), (16, code_dim),      # encoder
        (code_dim, 16), (16, 64), (64, 128), (128, in_dim),       # decoder
    ]
    params = []
    for (fan_in, fan_out) in dims:
        key, kw, kb = jax.random.split(key, 3)
        bound = 1.0 / math.sqrt(fan_in)
        w = jax.random.uniform(kw, (fan_in, fan_out), jnp.float32, -bound, bound)
        b = jax.random.uniform(kb, (fan_out,), jnp.float32, -bound, bound)
        params.append((w, b))
    return params


def reference_forward(x, params):
    """Plain-JAX reference (f32) for numerical sanity check."""
    h = x
    for idx in range(3):                     # encoder hidden layers
        w, b = params[idx]
        h = jnp.maximum(h @ w + b, 0.0)
    w, b = params[3]                         # code (no activation)
    h = h @ w + b
    for idx in range(4, 7):                  # decoder hidden layers
        w, b = params[idx]
        h = jnp.maximum(h @ w + b, 0.0)
    w, b = params[7]
    return jnp.tanh(h @ w + b)


if __name__ == "__main__":
    in_dim = 32
    code_dim = 8
    batch = 512          # multiple of batch_tile -> grid=(2,) keeps both v7x TCs busy

    key = jax.random.PRNGKey(0)
    key, kx = jax.random.split(key)
    x = jax.random.normal(kx, (batch, in_dim), jnp.float32)

    params = init_params(key, in_dim, code_dim)
    packed = pack_params(params)
    ref = reference_forward(x, params)

    # --- f32 compute path: tight correctness check (zero-padding is exact) ---
    out_f32 = jax.block_until_ready(
        autoencoder_forward(x, packed, batch_tile=256, compute_dtype=jnp.float32))
    assert out_f32.shape == (batch, in_dim)
    assert jnp.allclose(out_f32, ref, atol=1e-4, rtol=1e-4), "f32 mismatch vs reference"

    # --- bf16 MXU path (default, fast): relaxed tolerance ---
    out_bf16 = jax.block_until_ready(
        autoencoder_forward(x, packed, batch_tile=256, compute_dtype=jnp.bfloat16))
    assert out_bf16.shape == (batch, in_dim)
    assert float(jnp.max(jnp.abs(out_bf16 - ref))) < 6e-2, "bf16 mismatch vs reference"

    # --- ragged batch (wrapper padding path) ---
    out_ragged = jax.block_until_ready(
        autoencoder_forward(x[:200], packed, batch_tile=256, compute_dtype=jnp.float32))
    assert out_ragged.shape == (200, in_dim)
    assert jnp.allclose(out_ragged, ref[:200], atol=1e-4, rtol=1e-4), "ragged mismatch"

    print("KERNEL_OK")
</pallas_src>

<mosaic_0001>
module attributes {stable_mosaic.version = 11 : i64} {
  func.func @_autoencoder_kernel(%arg0: i32, %arg1: memref<256x32xf32, #tpu.memory_space<vmem>>, %arg2: memref<32x128xf32, #tpu.memory_space<vmem>>, %arg3: memref<6x128x128xf32, #tpu.memory_space<vmem>>, %arg4: memref<128x32xf32, #tpu.memory_space<vmem>>, %arg5: memref<7x128xf32, #tpu.memory_space<vmem>>, %arg6: memref<1x32xf32, #tpu.memory_space<vmem>>, %arg7: memref<256x32xf32, #tpu.memory_space<vmem>>) attributes {dimension_semantics = [#tpu.dimension_semantics<parallel>], iteration_bounds = array<i64: 2>, scalar_prefetch = 0 : i64, scratch_operands = 0 : i64, tpu.core_type = #tpu.core_type<tc>, window_params = [{transform_indices = @transform_0, window_bounds = array<i64: 256, 32>}, {pipeline_mode = #tpu.pipeline_mode<synchronous>, transform_indices = @transform_1, window_bounds = array<i64: 32, 128>}, {pipeline_mode = #tpu.pipeline_mode<synchronous>, transform_indices = @transform_2, window_bounds = array<i64: 6, 128, 128>}, {pipeline_mode = #tpu.pipeline_mode<synchronous>, transform_indices = @transform_3, window_bounds = array<i64: 128, 32>}, {pipeline_mode = #tpu.pipeline_mode<synchronous>, transform_indices = @transform_4, window_bounds = array<i64: 7, 128>}, {pipeline_mode = #tpu.pipeline_mode<synchronous>, transform_indices = @transform_5, window_bounds = array<i64: 1, 32>}, {transform_indices = @transform_6, window_bounds = array<i64: 256, 32>}]} {
    %c0 = arith.constant 0 : index
    %c0_0 = arith.constant 0 : index
    %0 = vector.load %arg1[%c0, %c0_0] : memref<256x32xf32, #tpu.memory_space<vmem>>, vector<256x32xf32>
    %c0_1 = arith.constant 0 : index
    %c0_2 = arith.constant 0 : index
    %1 = vector.load %arg2[%c0_1, %c0_2] : memref<32x128xf32, #tpu.memory_space<vmem>>, vector<32x128xf32>
    %cst = arith.constant dense<0.000000e+00> : vector<256x128xf32>
    %2 = tpu.matmul %0, %1, %cst {dimension_numbers = #tpu.dot_dimension_numbers<[1], [0], [0], [1], [0, 0, 1, 1], [], []>} : vector<256x32xf32>, vector<32x128xf32>, vector<256x128xf32> -> vector<256x128xf32>
    %c0_3 = arith.constant 0 : index
    %c0_4 = arith.constant 0 : index
    %3 = vector.load %arg5[%c0_3, %c0_4] : memref<7x128xf32, #tpu.memory_space<vmem>>, vector<1x128xf32>
    %4 = vector.broadcast %3 : vector<1x128xf32> to vector<256x128xf32>
    %5 = arith.addf %2, %4 : vector<256x128xf32>
    %cst_5 = arith.constant 0.000000e+00 : f32
    %6 = vector.broadcast %cst_5 : f32 to vector<256x128xf32>
    %7 = arith.maximumf %5, %6 : vector<256x128xf32>
    %c0_6 = arith.constant 0 : index
    %c0_7 = arith.constant 0 : index
    %c0_8 = arith.constant 0 : index
    %8 = vector.load %arg3[%c0_6, %c0_7, %c0_8] : memref<6x128x128xf32, #tpu.memory_space<vmem>>, vector<1x128x128xf32>
    %9 = vector.shape_cast %8 : vector<1x128x128xf32> to vector<128x128xf32>
    %cst_9 = arith.constant dense<0.000000e+00> : vector<256x128xf32>
    %10 = tpu.matmul %7, %9, %cst_9 {dimension_numbers = #tpu.dot_dimension_numbers<[1], [0], [0], [1], [0, 0, 1, 1], [], []>} : vector<256x128xf32>, vector<128x128xf32>, vector<256x128xf32> -> vector<256x128xf32>
    %c1 = arith.constant 1 : index
    %c0_10 = arith.constant 0 : index
    %11 = vector.load %arg5[%c1, %c0_10] : memref<7x128xf32, #tpu.memory_space<vmem>>, vector<1x128xf32>
    %12 = vector.broadcast %11 : vector<1x128xf32> to vector<256x128xf32>
    %13 = arith.addf %10, %12 : vector<256x128xf32>
    %cst_11 = arith.constant 0.000000e+00 : f32
    %14 = vector.broadcast %cst_11 : f32 to vector<256x128xf32>
    %15 = arith.maximumf %13, %14 : vector<256x128xf32>
    %c1_12 = arith.constant 1 : index
    %c0_13 = arith.constant 0 : index
    %c0_14 = arith.constant 0 : index
    %16 = vector.load %arg3[%c1_12, %c0_13, %c0_14] : memref<6x128x128xf32, #tpu.memory_space<vmem>>, vector<1x128x128xf32>
    %17 = vector.shape_cast %16 : vector<1x128x128xf32> to vector<128x128xf32>
    %cst_15 = arith.constant dense<0.000000e+00> : vector<256x128xf32>
    %18 = tpu.matmul %15, %17, %cst_15 {dimension_numbers = #tpu.dot_dimension_numbers<[1], [0], [0], [1], [0, 0, 1, 1], [], []>} : vector<256x128xf32>, vector<128x128xf32>, vector<256x128xf32> -> vector<256x128xf32>
    %c2 = arith.constant 2 : index
    %c0_16 = arith.constant 0 : index
    %19 = vector.load %arg5[%c2, %c0_16] : memref<7x128xf32, #tpu.memory_space<vmem>>, vector<1x128xf32>
    %20 = vector.broadcast %19 : vector<1x128xf32> to vector<256x128xf32>
    %21 = arith.addf %18, %20 : vector<256x128xf32>
    %cst_17 = arith.constant 0.000000e+00 : f32
    %22 = vector.broadcast %cst_17 : f32 to vector<256x128xf32>
    %23 = arith.maximumf %21, %22 : vector<256x128xf32>
    %c2_18 = arith.constant 2 : index
    %c0_19 = arith.constant 0 : index
    %c0_20 = arith.constant 0 : index
    %24 = vector.load %arg3[%c2_18, %c0_19, %c0_20] : memref<6x128x128xf32, #tpu.memory_space<vmem>>, vector<1x128x128xf32>
    %25 = vector.shape_cast %24 : vector<1x128x128xf32> to vector<128x128xf32>
    %cst_21 = arith.constant dense<0.000000e+00> : vector<256x128xf32>
    %26 = tpu.matmul %23, %25, %cst_21 {dimension_numbers = #tpu.dot_dimension_numbers<[1], [0], [0], [1], [0, 0, 1, 1], [], []>} : vector<256x128xf32>, vector<128x128xf32>, vector<256x128xf32> -> vector<256x128xf32>
    %c3 = arith.constant 3 : index
    %c0_22 = arith.constant 0 : index
    %27 = vector.load %arg5[%c3, %c0_22] : memref<7x128xf32, #tpu.memory_space<vmem>>, vector<1x128xf32>
    %28 = vector.broadcast %27 : vector<1x128xf32> to vector<256x128xf32>
    %29 = arith.addf %26, %28 : vector<256x128xf32>
    %c3_23 = arith.constant 3 : index
    %c0_24 = arith.constant 0 : index
    %c0_25 = arith.constant 0 : index
    %30 = vector.load %arg3[%c3_23, %c0_24, %c0_25] : memref<6x128x128xf32, #tpu.memory_space<vmem>>, vector<1x128x128xf32>
    %31 = vector.shape_cast %30 : vector<1x128x128xf32> to vector<128x128xf32>
    %cst_26 = arith.constant dense<0.000000e+00> : vector<256x128xf32>
    %32 = tpu.matmul %29, %31, %cst_26 {dimension_numbers = #tpu.dot_dimension_numbers<[1], [0], [0], [1], [0, 0, 1, 1], [], []>} : vector<256x128xf32>, vector<128x128xf32>, vector<256x128xf32> -> vector<256x128xf32>
    %c4 = arith.constant 4 : index
    %c0_27 = arith.constant 0 : index
    %33 = vector.load %arg5[%c4, %c0_27] : memref<7x128xf32, #tpu.memory_space<vmem>>, vector<1x128xf32>
    %34 = vector.broadcast %33 : vector<1x128xf32> to vector<256x128xf32>
    %35 = arith.addf %32, %34 : vector<256x128xf32>
    %cst_28 = arith.constant 0.000000e+00 : f32
    %36 = vector.broadcast %cst_28 : f32 to vector<256x128xf32>
    %37 = arith.maximumf %35, %36 : vector<256x128xf32>
    %c4_29 = arith.constant 4 : index
    %c0_30 = arith.constant 0 : index
    %c0_31 = arith.constant 0 : index
    %38 = vector.load %arg3[%c4_29, %c0_30, %c0_31] : memref<6x128x128xf32, #tpu.memory_space<vmem>>, vector<1x128x128xf32>
    %39 = vector.shape_cast %38 : vector<1x128x128xf32> to vector<128x128xf32>
    %cst_32 = arith.constant dense<0.000000e+00> : vector<256x128xf32>
    %40 = tpu.matmul %37, %39, %cst_32 {dimension_numbers = #tpu.dot_dimension_numbers<[1], [0], [0], [1], [0, 0, 1, 1], [], []>} : vector<256x128xf32>, vector<128x128xf32>, vector<256x128xf32> -> vector<256x128xf32>
    %c5 = arith.constant 5 : index
    %c0_33 = arith.constant 0 : index
    %41 = vector.load %arg5[%c5, %c0_33] : memref<7x128xf32, #tpu.memory_space<vmem>>, vector<1x128xf32>
    %42 = vector.broadcast %41 : vector<1x128xf32> to vector<256x128xf32>
    %43 = arith.addf %40, %42 : vector<256x128xf32>
    %cst_34 = arith.constant 0.000000e+00 : f32
    %44 = vector.broadcast %cst_34 : f32 to vector<256x128xf32>
    %45 = arith.maximumf %43, %44 : vector<256x128xf32>
    %c5_35 = arith.constant 5 : index
    %c0_36 = arith.constant 0 : index
    %c0_37 = arith.constant 0 : index
    %46 = vector.load %arg3[%c5_35, %c0_36, %c0_37] : memref<6x128x128xf32, #tpu.memory_space<vmem>>, vector<1x128x128xf32>
    %47 = vector.shape_cast %46 : vector<1x128x128xf32> to vector<128x128xf32>
    %cst_38 = arith.constant dense<0.000000e+00> : vector<256x128xf32>
    %48 = tpu.matmul %45, %47, %cst_38 {dimension_numbers = #tpu.dot_dimension_numbers<[1], [0], [0], [1], [0, 0, 1, 1], [], []>} : vector<256x128xf32>, vector<128x128xf32>, vector<256x128xf32> -> vector<256x128xf32>
    %c6 = arith.constant 6 : index
    %c0_39 = arith.constant 0 : index
    %49 = vector.load %arg5[%c6, %c0_39] : memref<7x128xf32, #tpu.memory_space<vmem>>, vector<1x128xf32>
    %50 = vector.broadcast %49 : vector<1x128xf32> to vector<256x128xf32>
    %51 = arith.addf %48, %50 : vector<256x128xf32>
    %cst_40 = arith.constant 0.000000e+00 : f32
    %52 = vector.broadcast %cst_40 : f32 to vector<256x128xf32>
    %53 = arith.maximumf %51, %52 : vector<256x128xf32>
    %c0_41 = arith.constant 0 : index
    %c0_42 = arith.constant 0 : index
    %54 = vector.load %arg4[%c0_41, %c0_42] : memref<128x32xf32, #tpu.memory_space<vmem>>, vector<128x32xf32>
    %cst_43 = arith.constant dense<0.000000e+00> : vector<256x32xf32>
    %55 = tpu.matmul %53, %54, %cst_43 {dimension_numbers = #tpu.dot_dimension_numbers<[1], [0], [0], [1], [0, 0, 1, 1], [], []>} : vector<256x128xf32>, vector<128x32xf32>, vector<256x32xf32> -> vector<256x32xf32>
    %c0_44 = arith.constant 0 : index
    %c0_45 = arith.constant 0 : index
    %56 = vector.load %arg6[%c0_44, %c0_45] : memref<1x32xf32, #tpu.memory_space<vmem>>, vector<1x32xf32>
    %57 = vector.broadcast %56 : vector<1x32xf32> to vector<256x32xf32>
    %58 = arith.addf %55, %57 : vector<256x32xf32>
    %59 = math.tanh %58 : vector<256x32xf32>
    %c0_46 = arith.constant 0 : index
    %c0_47 = arith.constant 0 : index
    %60 = vector.load %arg7[%c0_46, %c0_47] : memref<256x32xf32, #tpu.memory_space<vmem>>, vector<256x32xf32>
    tpu.vector_store %arg7[%c0_46, %c0_47], %59 {strides = array<i32>} : memref<256x32xf32, #tpu.memory_space<vmem>>, vector<256x32xf32>,
    return
  }
  func.func @transform_0(%arg0: i32) -> (i32, i32) {
    %c0_i32 = arith.constant 0 : i32
    %c0_i32_0 = arith.constant 0 : i32
    return %arg0, %c0_i32 : i32, i32
  }
  func.func @transform_1(%arg0: i32) -> (i32, i32) {
    %c0_i32 = arith.constant 0 : i32
    %c0_i32_0 = arith.constant 0 : i32
    %c0_i32_1 = arith.constant 0 : i32
    return %c0_i32, %c0_i32_0 : i32, i32
  }
  func.func @transform_2(%arg0: i32) -> (i32, i32, i32) {
    %c0_i32 = arith.constant 0 : i32
    %c0_i32_0 = arith.constant 0 : i32
    %c0_i32_1 = arith.constant 0 : i32
    %c0_i32_2 = arith.constant 0 : i32
    return %c0_i32, %c0_i32_0, %c0_i32_1 : i32, i32, i32
  }
  func.func @transform_3(%arg0: i32) -> (i32, i32) {
    %c0_i32 = arith.constant 0 : i32
    %c0_i32_0 = arith.constant 0 : i32
    %c0_i32_1 = arith.constant 0 : i32
    return %c0_i32, %c0_i32_0 : i32, i32
  }
  func.func @transform_4(%arg0: i32) -> (i32, i32) {
    %c0_i32 = arith.constant 0 : i32
    %c0_i32_0 = arith.constant 0 : i32
    %c0_i32_1 = arith.constant 0 : i32
    return %c0_i32, %c0_i32_0 : i32, i32
  }
  func.func @transform_5(%arg0: i32) -> (i32, i32) {
    %c0_i32 = arith.constant 0 : i32
    %c0_i32_0 = arith.constant 0 : i32
    %c0_i32_1 = arith.constant 0 : i32
    return %c0_i32, %c0_i32_0 : i32, i32
  }
  func.func @transform_6(%arg0: i32) -> (i32, i32) {
    %c0_i32 = arith.constant 0 : i32
    %c0_i32_0 = arith.constant 0 : i32
    return %arg0, %c0_i32 : i32, i32
  }
}

</mosaic_0001>

<bundles_post_ra>
// kernel: autoencoder_forward.1
= control target key start
LH: loop header
LB: loop body
LE: loop exit
PB: predicated region body
PF: predicated region fallthrough
CT: control target
= control target key end

     0   :  { %11 = vsyncpa [#allocation3], 0  ;;  %s5333_s0 = inlined_call_operand.hbm [shape: f32[512,32], index: 0, kind: input, shape index: {}]   ;;  %s5334_s1 = inlined_call_operand.hbm [shape: f32[32,128], index: 1, kind: input, shape index: {}]   ;;  %s5335_s2 = inlined_call_operand.hbm [shape: f32[6,128,128], index: 2, kind: input, shape index: {}]   ;;  %s5336_s3 = inlined_call_operand.hbm [shape: f32[128,32], index: 3, kind: input, shape index: {}]   ;;  %s5337_s4 = inlined_call_operand.hbm [shape: f32[7,128], index: 4, kind: input, shape index: {}]   ;;  %s5338_s5 = inlined_call_operand.hbm [shape: f32[1,32], index: 5, kind: input, shape index: {}]   ;;  %s5339_s6 = inlined_call_operand.hbm [shape: f32[512,32], index: 6, kind: output, shape index: {}]  }
   0x1   :  { %13 = vsyncpa [#allocation3 + $0x1], 0 }
   0x2   :  { %14 = vsyncpa [#allocation6], 0 }
   0x3   :  { %15 = vsyncpa [#allocation9], 0 }
   0x4   :  { %16 = vsyncpa [#allocation12], 0 }
   0x5   :  { %17 = vsyncpa [#allocation4], 0 }
   0x6   :  { %19 = vsyncpa [#allocation4 + $0x1], 0  ;;  %s4587_s21 = smov 0   ;;  %s4589_s22 = smov 0  }
   0x7   :  { %s4591_s23 = smov 0   ;;  %s4593_s24 = smov 0  }
   0x8 LB: > { %s4541_s25 = smov [#allocation5]   ;;  %s4608_s27 = sadd.s32 4294967295, %s4539_s24   ;;  %s4539_s24 = sphi %s4593_s24, %s5364_s24   ;;  %s4535_s23 = sphi %s4591_s23, %s5363_s23   ;;  %s4531_s22 = sphi %s4589_s22, %s5362_s22   ;;  %s4527_s21 = sphi %s4587_s21, %s5361_s21  }
   0x9   : > { %s199_s26 = sshll.u32 %s4541_s25, 4  ;;  %p2825_p0 = scmp.ge.s32.totalorder %s4539_s24, 1  ;;  %s4613_s26 = int_to_ptr.vmem [resolvable:$true] %s199_s26 }
   0xa   : > { %p5340_p1 = scmp.eq.s32.totalorder %s4608_s27, 0  ;;  %p187_p2 = scmp.lt.s32.totalorder %s4539_s24, 3 }
   0xb   : > { %s4542_s29 = smov [#allocation8]   ;;  %s4543_s8 = smov [#allocation7]  }
   0xc   : > { %p4615_p3 = pnand %p2825_p0, %p187_p2  ;;  %s225_s30 = sshll.u32 %s4542_s29, 4  ;;  %s4628_s30 = int_to_ptr.vmem [resolvable:$true] %s225_s30 }
   0xd   : > { %s212_s9 = sshll.u32 %s4543_s8, 4  ;;  %s4291_s12 = scalar_lea.hbm %s5334_s1, 512  ;;  %s4630_s9 = int_to_ptr.vmem [resolvable:$true] %s212_s9 }
   0xe   : > { %s5343_s28 = scalar_select %p4615_p3, 1, 0 }
   0xf   : > { %p4150_p5 = pneg %p4615_p3  ;;  %p4292_p7 = scmp.ne.s32.totalorder %s5334_s1, %s4291_s12 }
  0x10   : > { %p4298_p11 = scmp.lt.u32.totalorder %s4291_s12, %s5334_s1 }
  0x11   : > { %p4624_p6 = pnand %p4150_p5, %p5340_p1 }
  0x13   : > { %p4640_p8 = pneg %p4624_p6 }
  0x15   : > { %p4294_p9 = pnand %p4640_p8, %p4292_p7 }
  0x17   : > { %p4295_p10 = pneg %p4294_p9 }
  0x19   : > { %p4300_p12 = pnand %p4298_p11, %p4295_p10 }
  0x1b   : > { %4303 = shalt.err (!%p4300_p12)
}
  0x1c   : > { %s4304_s18 = scalar_lea.vmem %s4613_s26, 512  ;;  %p4312_p5 = scmp.lt.s32.totalorder %s4613_s26, %s4613_s26 }
  0x1d   : > { %p4305_p13 = scmp.ne.s32.totalorder %s4613_s26, %s4304_s18  ;;  %p4313_p4 = scmp.lt.s32.totalorder %s4304_s18, %s4304_s18 }
  0x1f   : > { %p4307_p0 = pnand %p4305_p13, %p4640_p8  ;;  %p4314_p7 = por %p4313_p4, %p4312_p5 }
  0x21   : > { %p4308_p2 = pneg %p4307_p0 }
  0x23   : > { %p4315_p9 = pnand %p4314_p7, %p4308_p2 }
  0x25   : > { %4318 = shalt.err (!%p4315_p9)
}
  0x26   : > { %s4544_s19 = smov 128   ;;  %s4545_s20 = smov 8  }
  0x27   : > { %4153 = dma.hbm_to_vmem [thread:$0]  (!%p4624_p6), %s5334_s1, 512, %s4613_s26, [#allocation6], %s4544_s19, %s4544_s19, %s4545_s20  }
  0x28   : > { %s4319_s11 = scalar_lea.hbm %s5336_s3, 2048 }
  0x29   : > { %p4320_p4 = scmp.ne.s32.totalorder %s5336_s3, %s4319_s11  ;;  %p4326_p12 = scmp.lt.u32.totalorder %s4319_s11, %s5336_s3 }
  0x2b   : > { %p4322_p10 = pnand %p4320_p4, %p4640_p8 }
  0x2d   : > { %p4323_p11 = pneg %p4322_p10 }
  0x2f   : > { %p4328_p13 = pnand %p4326_p12, %p4323_p11 }
  0x31   : > { %4331 = shalt.err (!%p4328_p13)
}
  0x32   : > { %s4332_s26 = scalar_lea.vmem %s4628_s30, 2048  ;;  %p4340_p7 = scmp.lt.s32.totalorder %s4628_s30, %s4628_s30 }
  0x33   : > { %p4333_p0 = scmp.ne.s32.totalorder %s4628_s30, %s4332_s26  ;;  %p4341_p9 = scmp.lt.s32.totalorder %s4332_s26, %s4332_s26 }
  0x35   : > { %p4335_p2 = pnand %p4333_p0, %p4640_p8  ;;  %p4342_p4 = por %p4341_p9, %p4340_p7 }
  0x37   : > { %p4336_p5 = pneg %p4335_p2 }
  0x39   : > { %p4343_p10 = pnand %p4342_p4, %p4336_p5 }
  0x3b   : > { %4346 = shalt.err (!%p4343_p10)
}
  0x3c   : > { %4159 = dma.hbm_to_vmem [thread:$0]  (!%p4624_p6), %s5336_s3, 2048, %s4628_s30, [#allocation9], %s4544_s19, %s4544_s19, %s4545_s20  }
  0x3d   : > { %s4347_s8 = scalar_lea.hbm %s5335_s2, 12288 }
  0x3e   : > { %p4348_p11 = scmp.ne.s32.totalorder %s5335_s2, %s4347_s8  ;;  %p4354_p0 = scmp.lt.u32.totalorder %s4347_s8, %s5335_s2 }
  0x40   : > { %p4350_p12 = pnand %p4348_p11, %p4640_p8 }
  0x42   : > { %p4351_p13 = pneg %p4350_p12 }
  0x44   : > { %p4356_p2 = pnand %p4354_p0, %p4351_p13 }
  0x46   : > { %4359 = shalt.err (!%p4356_p2)
}
  0x47   : > { %s4360_s30 = scalar_lea.vmem %s4630_s9, 12288  ;;  %p4368_p4 = scmp.lt.s32.totalorder %s4630_s9, %s4630_s9 }
  0x48   : > { %p4361_p5 = scmp.ne.s32.totalorder %s4630_s9, %s4360_s30  ;;  %p4369_p10 = scmp.lt.s32.totalorder %s4360_s30, %s4360_s30 }
  0x4a   : > { %p4363_p7 = pnand %p4361_p5, %p4640_p8  ;;  %p4370_p11 = por %p4369_p10, %p4368_p4 }
  0x4c   : > { %p4364_p9 = pneg %p4363_p7 }
  0x4e   : > { %p4371_p12 = pnand %p4370_p11, %p4364_p9 }
  0x50   : > { %4374 = shalt.err (!%p4371_p12)
}
  0x51   : > { %4156 = dma.hbm_to_vmem [thread:$0]  (!%p4624_p6), %s5335_s2, 12288, %s4630_s9, [#allocation6], %s4544_s19, %s4544_s19, %s4545_s20  }
  0x52   : > { %s4546_s26 = smov [#allocation10]   ;;  %s4547_s18 = smov [#allocation11]  }
  0x53   : > { %s239_s17 = sshll.u32 %s4546_s26, 4  ;;  %s250_s25 = sshll.u32 %s4547_s18, 4  ;;  %s240_s17 = int_to_ptr.vmem [resolvable:$true] %s239_s17  ;;  %s251_s25 = int_to_ptr.vmem [resolvable:$true] %s250_s25 }
  0x54   : > { %s4375_s10 = scalar_lea.hbm %s5337_s4, 128 }
  0x55   : > { %p4376_p13 = scmp.ne.s32.totalorder %s5337_s4, %s4375_s10  ;;  %p4382_p5 = scmp.lt.u32.totalorder %s4375_s10, %s5337_s4 }
  0x57   : > { %p4378_p0 = pnand %p4376_p13, %p4640_p8 }
  0x59   : > { %p4379_p2 = pneg %p4378_p0 }
  0x5b   : > { %p4384_p7 = pnand %p4382_p5, %p4379_p2 }
  0x5d   : > { %4387 = shalt.err (!%p4384_p7)
}
  0x5e   : > { %s4388_s9 = scalar_lea.vmem %s240_s17, 128  ;;  %p4396_p11 = scmp.lt.s32.totalorder %s240_s17, %s240_s17 }
  0x5f   : > { %p4389_p9 = scmp.ne.s32.totalorder %s240_s17, %s4388_s9  ;;  %p4397_p12 = scmp.lt.s32.totalorder %s4388_s9, %s4388_s9 }
  0x61   : > { %p4391_p4 = pnand %p4389_p9, %p4640_p8  ;;  %p4398_p1 = por %p4397_p12, %p4396_p11 }
  0x63   : > { %p4392_p10 = pneg %p4391_p4 }
  0x65   : > { %p4399_p3 = pnand %p4398_p1, %p4392_p10 }
  0x67   : > { %4402 = shalt.err (!%p4399_p3)
}
  0x68   : > { %4162 = dma.hbm_to_vmem [thread:$0]  (!%p4624_p6), %s5337_s4, 128, %s240_s17, [#allocation9]  }
  0x69   : > { %s4403_s29 = scalar_lea.hbm %s5338_s5, 16 }
  0x6a   : > { %p4404_p13 = scmp.ne.s32.totalorder %s5338_s5, %s4403_s29  ;;  %p4410_p3 = scmp.lt.u32.totalorder %s4403_s29, %s5338_s5 }
  0x6c   : > { %p4406_p0 = pnand %p4404_p13, %p4640_p8 }
  0x6e   : > { %p4407_p1 = pneg %p4406_p0 }
  0x70   : > { %p4412_p2 = pnand %p4410_p3, %p4407_p1 }
  0x72   : > { %4415 = shalt.err (!%p4412_p2)
}
  0x73   : > { %s4416_s13 = scalar_lea.vmem %s251_s25, 16  ;;  %s4423_s17 = scalar_lea.vmem %s251_s25, 32 }
  0x74   : > { %p4417_p5 = scmp.ne.s32.totalorder %s251_s25, %s4416_s13  ;;  %p4424_p4 = scmp.lt.s32.totalorder %s251_s25, %s251_s25 }
  0x75   : > { %p4425_p10 = scmp.lt.s32.totalorder %s4423_s17, %s4416_s13 }
  0x76   : > { %p4419_p7 = pnand %p4417_p5, %p4640_p8 }
  0x77   : > { %p4426_p11 = por %p4425_p10, %p4424_p4 }
  0x78   : > { %p4420_p9 = pneg %p4419_p7 }
  0x7a   : > { %p4427_p12 = pnand %p4426_p11, %p4420_p9 }
  0x7c   : > { %4430 = shalt.err (!%p4427_p12)
}
  0x7d   : > { %4165 = dma.hbm_to_vmem [thread:$0]  (!%p4624_p6), %s5338_s5, 16, %s251_s25, [#allocation12]  }
  0x7e   : > { %s2824_s15 = sadd.s32 4294967294, %s4539_s24   ;;  %s4754_s7 = sadd.s32 1, %s4539_s24  }
  0x7f   : > { %s32_s14 = sadd.s32 1, %s4535_s23  ;;  %s29_s16 = ssub.s32 %s4539_s24, %s4754_s7 }
  0x80   : > { %p39_p8 = scmp.ne.s32.totalorder %s4535_s23, %s4531_s22  ;;  %p30_p13 = scmp.eq.s32.totalorder %s29_s16, 0 }
  0x81   : > { %p40_p0 = scmp.eq.s32.totalorder %s4539_s24, 0  ;;  %p45_p1 = scmp.ne.s32.totalorder %s4531_s22, %s4527_s21 }
  0x82   : > { %p174_p3 = scmp.eq.s32.totalorder %s4608_s27, 1  ;;  %p5346_p5 = scmp.eq.s32.totalorder %s4608_s27, 0 }
  0x83   : > { %s4766_s26 = scalar_select %p30_p13, %s4535_s23, %s32_s14  }
  0x84   : > { %p41_p2 = por %p40_p0, %p39_p8  ;;  %p4770_p7 = por %p5346_p5, %p45_p1 }
  0x85   : > { %p4774_p6 = por %p174_p3, %p39_p8  ;;  %p180_p9 = scmp.eq.s32.totalorder %s2824_s15, 1 }
  0x86   : > { %p4179_p4 = scmp.lt.s32.totalorder %s4539_s24, 2  ;;  %s261_s29 = sand.u32 1, %s4535_s23  }
  0x87   : > { %s5348_s25 = scalar_select %p4774_p6, 1, 0 }
  0x88   : > { %p4780_p10 = por %p180_p9, %p45_p1  ;;  %s2832_s10 = sshll.u32 %s261_s29, 8 }
  0x89   : > { %s2888_s11 = sshll.u32 %s4539_s24, 12  ;;  %s265_s30 = scalar_lea.vmem [#allocation2], %s2832_s10 }
  0x8a   : > { %s5349_s8 = scalar_select %p4780_p10, 1, 0 }
  0x8b   : > { %s4788_s17 = scalar_lea.hbm %s5333_s0, %s2888_s11  ;;  %s272_s9 = sshll.u32 %s265_s30, 4  ;;  %s4794_s9 = int_to_ptr.vmem [resolvable:$true] %s272_s9 }
  0x8c   : > { %p4790_p11 = pnand %p4179_p4, %p41_p2  ;;  %s4796_s14 = scalar_lea.sflag [#allocation3], %s261_s29 }
  0x8d   : > { %s4431_s16 = scalar_lea.hbm %s4788_s17, 4096  ;;  %s4436_s12 = scalar_lea.hbm %s5333_s0, 8192 }
  0x8e   : > { %p4432_p12 = scmp.ne.s32.totalorder %s4788_s17, %s4431_s16  ;;  %p4433_p8 = pneg %p4790_p11 }
  0x8f   : > { %p4437_p1 = scmp.lt.u32.totalorder %s4788_s17, %s5333_s0  ;;  %p4438_p3 = scmp.lt.u32.totalorder %s4436_s12, %s4431_s16 }
  0x90   : > { %p4434_p13 = pnand %p4433_p8, %p4432_p12  ;;  %p4440_p5 = scmp.lt.u32.totalorder %s4431_s16, %s4788_s17 }
  0x91   : > { %p4439_p2 = por %p4438_p3, %p4437_p1 }
  0x92   : > { %p4435_p0 = pneg %p4434_p13 }
  0x93   : > { %p4441_p9 = por %p4440_p5, %p4439_p2 }
  0x95   : > { %p4442_p4 = pnand %p4441_p9, %p4435_p0 }
  0x97   : > { %4445 = shalt.err (!%p4442_p4)
}
  0x98   : > { %s4446_s29 = scalar_lea.vmem %s4794_s9, 4096  ;;  %s4548_s10 = smov [#allocation2]  }
  0x99   : > { %p4447_p12 = scmp.ne.s32.totalorder %s4794_s9, %s4446_s29  ;;  %s4451_s11 = sshll.u32 %s4548_s10, 4  ;;  %s4452_s11 = int_to_ptr.vmem [resolvable:$false] %s4451_s11 }
  0x9a   : > { %s4453_s13 = scalar_lea.vmem %s4452_s11, 8192  ;;  %p4454_p6 = scmp.lt.s32.totalorder %s4794_s9, %s4452_s11 }
  0x9b   : > { %p4449_p13 = pnand %p4447_p12, %p4433_p8  ;;  %p4455_p1 = scmp.lt.s32.totalorder %s4453_s13, %s4446_s29 }
  0x9d   : > { %p4450_p10 = pneg %p4449_p13  ;;  %p4456_p3 = por %p4455_p1, %p4454_p6 }
  0x9f   : > { %p4457_p2 = pnand %p4456_p3, %p4450_p10 }
  0xa1   : > { %4460 = shalt.err (!%p4457_p2)
}
  0xa2   : > { %4169 = dma.hbm_to_vmem [thread:$0]  (!%p4790_p11), %s4788_s17, 4096, %s4794_s9, %s4796_s14, %s4544_s19, %s4544_s19, %s4545_s20  }
  0xa3   : > { %p5351_p8 = scmp.ne.s32.totalorder %s5343_s28, 0 }
  0xa4   : > { %s4830_s16 = sand.u32 (!%p5351_p8), 1, %s4531_s22  }
  0xa5   : > { %284 = sbr.rel (%p5351_p8) target bundleno = 2019 (0x7e3), region = 44  ;;  %s2836_s12 = sshll.u32 (!%p5351_p8), %s4830_s16, 8 }
  0xa6   : > { %s287_s30 = scalar_lea.sflag (!%p5351_p8), [#allocation3], %s4830_s16  ;;  %s4836_s15 = scalar_lea.vmem (!%p5351_p8), [#allocation2], %s2836_s12 }
  0xac   : > { %4506 = dma.done.wait (%p4770_p7), %s287_s30, 4096  }
  0xad   : > { %4508 = vsyncadd (%p4770_p7), %s287_s30, 4294963200  ;;  %p5352_p6 = scmp.eq.s32.totalorder %s4608_s27, 0 }
  0xaf   : > { %4510 = dma.done.wait (%p5352_p6), [#allocation6], 12800   ;;  %p5353_p10 = pmov %p5352_p6 }
  0xb0   : > { %p5354_p11 = pmov %p5352_p6 }
  0xb1   : > { %4512 = vsyncadd (%p5353_p10), [#allocation6], 4294954496 }
  0xb2   : > { %4514 = dma.done.wait (%p5354_p11), [#allocation9], 2176   ;;  %p5355_p0 = pmov %p5352_p6 }
  0xb4   : > { %4516 = vsyncadd (%p5355_p0), [#allocation9], 4294965120  ;;  %p5356_p5 = pmov %p5355_p0 }
  0xb5   : > { %p5357_p9 = pmov %p5355_p0 }
  0xb6   : > { %4518 = dma.done.wait (%p5356_p5), [#allocation12], 16  }
  0xb7   : > { %4520 = vsyncadd (%p5357_p9), [#allocation12], 4294967280  ;;  %vm382_vm0 = vcmask 261120   ;;  %v373_v0 = vld [vmem:[#allocation5] sm:$0xff]  ;;  %v374_v1 = vld [vmem:[#allocation5 + $0x8] sm:$0xff]  ;;  %s5191_s28 = scalar_lea.vmem [#allocation13], %s2836_s12 }
  0xb8   : > { %v375_v2 = vld [vmem:[#allocation5 + $0x10] sm:$0xff]  ;;  %v3878_v3 = vpack.c.bf16 %v374_v1, %v373_v0  ;;  %v376_v4 = vld [vmem:[#allocation5 + $0x18] sm:$0xff]  ;;  %v341_v5 = vld [vmem:[%s4836_s15] sm:$0xff]  ;;  %s2889_s19 = sshll.u32 %s4608_s27, 12  ;;  %s2703_s20 = sshll.u32 %s5191_s28, 4  ;;  %s5285_s20 = int_to_ptr.vmem [resolvable:$true] %s2703_s20 }
  0xb9   : > { %v3882_v6 = vpack.c.bf16 %v376_v4, %v375_v2  ;;  %3270 = vmatprep.mubr.msk.f32.mxu0 %vm382_vm0, %v341_v5  ;;  %v342_v7 = vld [vmem:[%s4836_s15 + $0x8] sm:$0xff]  ;;  %v343_v8 = vld [vmem:[%s4836_s15 + $0x10] sm:$0xff]  ;;  %v344_v9 = vld [vmem:[%s4836_s15 + $0x18] sm:$0xff]  ;;  %s5283_s9 = scalar_lea.hbm %s5339_s6, %s2889_s19  ;;  %s2690_s27 = scalar_lea.sflag [#allocation4], %s4830_s16 }
  0xba   : > { %3879 = vmatprep.subr.bf16.mxu0 %v3878_v3  ;;  %v736_v10 = vld [vmem:[#allocation7] sm:$0xff]  ;;  %v737_v11 = vld [vmem:[#allocation7 + $0x8] sm:$0xff]  ;;  %v738_v12 = vld [vmem:[#allocation7 + $0x10] sm:$0xff]  ;;  %s4461_s14 = scalar_lea.vmem %s5285_s20, 4096  ;;  %p5358_p4 = scmp.ne.s32.totalorder %s5348_s25, 0 }
  0xbb   : > { %3881 = vmatpush3.bf16.msra.mxu0 %v3878_v3  ;;  %v345_v13 = vld [vmem:[%s4836_s15 + $0x20] sm:$0xff]  ;;  %v3886_v14 = vpack.c.bf16 %v737_v11, %v736_v10  ;;  %v739_v15 = vld [vmem:[#allocation7 + $0x18] sm:$0xff]  ;;  %v741_v18 = vld [vmem:[#allocation7 + $0x28] sm:$0xff]  ;;  %p4462_p7 = scmp.ne.s32.totalorder %s5285_s20, %s4461_s14  ;;  %s4549_s29 = smov [#allocation13]  }
  0xbc   : > { %3883 = vmatprep.subr.bf16.mxu0 %v3882_v6  ;;  %v3890_v16 = vpack.c.bf16 %v739_v15, %v738_v12  ;;  %v740_v17 = vld [vmem:[#allocation7 + $0x20] sm:$0xff]  ;;  %v346_v19 = vld [vmem:[%s4836_s15 + $0x28] sm:$0xff]  ;;  %v347_v20 = vld [vmem:[%s4836_s15 + $0x30] sm:$0xff]  ;;  %s4465_s10 = sshll.u32 %s4549_s29, 4  ;;  %s4466_s10 = int_to_ptr.vmem [resolvable:$false] %s4465_s10 }
  0xbd   : > { %3887 = vmatprep.subr.bf16.mxu1 %v3886_v14  ;;  %v3894_v21 = vpack.c.bf16 %v741_v18, %v740_v17  ;;  %v742_v22 = vld [vmem:[#allocation7 + $0x30] sm:$0xff]  ;;  %v743_v23 = vld [vmem:[#allocation7 + $0x38] sm:$0xff]  ;;  %v349_v25 = vld [vmem:[%s4836_s15 + $0x40] sm:$0xff]  ;;  %p4463_p12 = pnand %p4462_p7, %p5358_p4  ;;  %s4467_s11 = scalar_lea.vmem %s4466_s10, 8192 }
  0xbe   : > { %3889 = vmatpush3.bf16.msra.mxu1 %v3886_v14  ;;  %v348_v24 = vld [vmem:[%s4836_s15 + $0x38] sm:$0xff]  ;;  %v3898_v26 = vpack.c.bf16 %v743_v23, %v742_v22  ;;  %v744_v27 = vld [vmem:[#allocation7 + $0x40] sm:$0xff]  ;;  %v745_v28 = vld [vmem:[#allocation7 + $0x48] sm:$0xff]  ;;  %p4468_p1 = scmp.lt.s32.totalorder %s5285_s20, %s4466_s10  ;;  %p4469_p3 = scmp.lt.s32.totalorder %s4467_s11, %s4461_s14 }
  0xbf   : > { %3885 = vmatpush3.bf16.msra.mxu0 %v3882_v6  ;;  %3891 = vmatprep.subr.bf16.mxu1 %v3890_v16  ;;  %v350_v29 = vld [vmem:[%s4836_s15 + $0x48] sm:$0xff]  ;;  %v351_v30 = vld [vmem:[%s4836_s15 + $0x50] sm:$0xff]  ;;  %v3902_v31 = vpack.c.bf16 %v745_v28, %v744_v27  ;;  %v747_v33 = vld [vmem:[#allocation7 + $0x58] sm:$0xff]  ;;  %p4464_p13 = pneg %p4463_p12 }
  0xc0   : > { %v746_v32 = vld [vmem:[#allocation7 + $0x50] sm:$0xff]  ;;  %v352_v34 = vld [vmem:[%s4836_s15 + $0x58] sm:$0xff]  ;;  %v353_v35 = vld [vmem:[%s4836_s15 + $0x60] sm:$0xff]  ;;  %p4470_p2 = por %p4469_p3, %p4468_p1 }
  0xc1   : > { %v3906_v36 = vpack.c.bf16 %v747_v33, %v746_v32  ;;  %v748_v37 = vld [vmem:[#allocation7 + $0x60] sm:$0xff]  ;;  %v749_v38 = vld [vmem:[#allocation7 + $0x68] sm:$0xff]  ;;  %v355_v40 = vld [vmem:[%s4836_s15 + $0x70] sm:$0xff] }
  0xc2   : > { %3271 = vmatmul.mubr.msk.f32.vlgmr.msra.gmra.mrb[0].mxu0 %vm382_vm0, %v342_v7  ;;  %3893 = vmatpush3.bf16.msra.mxu1 %v3890_v16  ;;  %v354_v39 = vld [vmem:[%s4836_s15 + $0x68] sm:$0xff]  ;;  %v3910_v41 = vpack.c.bf16 %v749_v38, %v748_v37  ;;  %v356_v42 = vld [vmem:[%s4836_s15 + $0x78] sm:$0xff]  ;;  %v357_v43 = vld [vmem:[%s4836_s15 + $0x80] sm:$0xff]  ;;  %p4471_p8 = pnand %p4470_p2, %p4464_p13 }
  0xc3   : > { %3273 = vmatprep.mubr.msk.f32.mxu0 %vm382_vm0, %v343_v8  ;;  %3895 = vmatprep.subr.bf16.mxu1 %v3894_v21  ;;  %v358_v44 = vld [vmem:[%s4836_s15 + $0x88] sm:$0xff]  ;;  %v359_v45 = vld [vmem:[%s4836_s15 + $0x90] sm:$0xff]  ;;  %v360_v46 = vld [vmem:[%s4836_s15 + $0x98] sm:$0xff] }
  0xc4   : > { %v361_v47 = vld [vmem:[%s4836_s15 + $0xa0] sm:$0xff]  ;;  %v362_v48 = vld [vmem:[%s4836_s15 + $0xa8] sm:$0xff]  ;;  %v363_v49 = vld [vmem:[%s4836_s15 + $0xb0] sm:$0xff] }
  0xc5   : > { %v364_v50 = vld [vmem:[%s4836_s15 + $0xb8] sm:$0xff]  ;;  %v365_v51 = vld [vmem:[%s4836_s15 + $0xc0] sm:$0xff]  ;;  %v366_v52 = vld [vmem:[%s4836_s15 + $0xc8] sm:$0xff] }
  0xc6   : > { %3274 = vmatmul.mubr.msk.f32.gmra.mrb[2].mxu0 %vm382_vm0, %v344_v9  ;;  %3897 = vmatpush3.bf16.msra.mxu1 %v3894_v21  ;;  %v367_v53 = vld [vmem:[%s4836_s15 + $0xd0] sm:$0xff]  ;;  %v368_v54 = vld [vmem:[%s4836_s15 + $0xd8] sm:$0xff]  ;;  %v369_v55 = vld [vmem:[%s4836_s15 + $0xe0] sm:$0xff] }
  0xc7   : > { %3276 = vmatprep.mubr.msk.f32.mxu0 %vm382_vm0, %v345_v13  ;;  %3899 = vmatprep.subr.bf16.mxu1 %v3898_v26  ;;  %v370_v56 = vld [vmem:[%s4836_s15 + $0xe8] sm:$0xff]  ;;  %v371_v57 = vld [vmem:[%s4836_s15 + $0xf0] sm:$0xff]  ;;  %v372_v58 = vld [vmem:[%s4836_s15 + $0xf8] sm:$0xff] }
  0xc8   : > { %v750_v59 = vld [vmem:[#allocation7 + $0x70] sm:$0xff]  ;;  %v751_v60 = vld [vmem:[#allocation7 + $0x78] sm:$0xff]  ;;  %v1015_v62 = vld [vmem:[#allocation7 + $0x80] sm:$0xff] }
  0xc9   : > { %v3914_v61 = vpack.c.bf16 %v751_v60, %v750_v59  ;;  %v1016_v63 = vld [vmem:[#allocation7 + $0x88] sm:$0xff]  ;;  %v1017_v0 = vld [vmem:[#allocation7 + $0x90] sm:$0xff]  ;;  %v1018_v2 = vld [vmem:[#allocation7 + $0x98] sm:$0xff] }
  0xca   : > { %3277 = vmatmul.mubr.msk.f32.gmra.mrb[4].mxu0 %vm382_vm0, %v346_v19  ;;  %3901 = vmatpush3.bf16.msra.mxu1 %v3898_v26  ;;  %v3918_v1 = vpack.c.bf16 %v1016_v63, %v1015_v62  ;;  %v3922_v3 = vpack.c.bf16 %v1018_v2, %v1017_v0  ;;  %v1019_v4 = vld [vmem:[#allocation7 + $0xa0] sm:$0xff]  ;;  %v1020_v5 = vld [vmem:[#allocation7 + $0xa8] sm:$0xff]  ;;  %v1021_v7 = vld [vmem:[#allocation7 + $0xb0] sm:$0xff] }
  0xcb   : > { %3279 = vmatprep.mubr.msk.f32.mxu0 %vm382_vm0, %v347_v20  ;;  %3903 = vmatprep.subr.bf16.mxu1 %v3902_v31  ;;  %v3926_v6 = vpack.c.bf16 %v1020_v5, %v1019_v4  ;;  %v1022_v8 = vld [vmem:[#allocation7 + $0xb8] sm:$0xff]  ;;  %v1023_v10 = vld [vmem:[#allocation7 + $0xc0] sm:$0xff]  ;;  %v1024_v11 = vld [vmem:[#allocation7 + $0xc8] sm:$0xff] }
  0xcc   : > { %3919 = vmatprep.subr.bf16.mxu0 %v3918_v1  ;;  %v3930_v9 = vpack.c.bf16 %v1022_v8, %v1021_v7  ;;  %v3934_v12 = vpack.c.bf16 %v1024_v11, %v1023_v10  ;;  %v1025_v13 = vld [vmem:[#allocation7 + $0xd0] sm:$0xff]  ;;  %v1026_v14 = vld [vmem:[#allocation7 + $0xd8] sm:$0xff]  ;;  %v1027_v16 = vld [vmem:[#allocation7 + $0xe0] sm:$0xff] }
  0xcd   : > { %3921 = vmatpush3.bf16.msra.mxu0 %v3918_v1  ;;  %v3938_v15 = vpack.c.bf16 %v1026_v14, %v1025_v13  ;;  %v1028_v17 = vld [vmem:[#allocation7 + $0xe8] sm:$0xff]  ;;  %v1029_v19 = vld [vmem:[#allocation7 + $0xf0] sm:$0xff]  ;;  %v1030_v20 = vld [vmem:[#allocation7 + $0xf8] sm:$0xff] }
  0xce   : > { %3280 = vmatmul.mubr.msk.f32.gmra.mrb[6].mxu0 %vm382_vm0, %v348_v24  ;;  %3905 = vmatpush3.bf16.msra.mxu1 %v3902_v31  ;;  %v3942_v18 = vpack.c.bf16 %v1028_v17, %v1027_v16  ;;  %v3946_v21 = vpack.c.bf16 %v1030_v20, %v1029_v19  ;;  %v4918_v22 = vld [vmem:[#allocation10] ss:$0 sm:$0xff] }
  0xcf   : > { %3282 = vmatprep.mubr.msk.f32.mxu0 %vm382_vm0, %v349_v25  ;;  %3907 = vmatprep.subr.bf16.mxu1 %v3906_v36 }
  0xd0   : > { %3923 = vmatprep.subr.bf16.mxu0 %v3922_v3 }
  0xd1   : > { %3925 = vmatpush3.bf16.msra.mxu0 %v3922_v3 }
  0xd2   : > { %3283 = vmatmul.mubr.msk.f32.gmra.mrb[8].mxu0 %vm382_vm0, %v350_v29  ;;  %3909 = vmatpush3.bf16.msra.mxu1 %v3906_v36 }
  0xd3   : > { %3285 = vmatprep.mubr.msk.f32.mxu0 %vm382_vm0, %v351_v30  ;;  %3911 = vmatprep.subr.bf16.mxu1 %v3910_v41 }
  0xd4   : > { %3927 = vmatprep.subr.bf16.mxu0 %v3926_v6 }
  0xd5   : > { %3929 = vmatpush3.bf16.msra.mxu0 %v3926_v6 }
  0xd6   : > { %3286 = vmatmul.mubr.msk.f32.gmra.mrb[10].mxu0 %vm382_vm0, %v352_v34  ;;  %3913 = vmatpush3.bf16.msra.mxu1 %v3910_v41 }
  0xd7   : > { %3288 = vmatprep.mubr.msk.f32.mxu0 %vm382_vm0, %v353_v35  ;;  %3915 = vmatprep.subr.bf16.mxu1 %v3914_v61 }
  0xd8   : > { %3931 = vmatprep.subr.bf16.mxu0 %v3930_v9 }
  0xd9   : > { %3933 = vmatpush3.bf16.msra.mxu0 %v3930_v9 }
  0xda   : > { %3289 = vmatmul.mubr.msk.f32.gmra.mrb[12].mxu0 %vm382_vm0, %v354_v39  ;;  %3917 = vmatpush3.bf16.msra.mxu1 %v3914_v61 }
  0xdb   : > { %3291 = vmatprep.mubr.msk.f32.mxu0 %vm382_vm0, %v355_v40  ;;  %3935 = vmatprep.subr.bf16.mxu0 %v3934_v12 }
  0xdd   : > { %3937 = vmatpush3.bf16.msra.mxu0 %v3934_v12 }
  0xde   : > { %3292 = vmatmul.mubr.msk.f32.gmra.mrb[14].mxu0 %vm382_vm0, %v356_v42  ;;  %3939 = vmatprep.subr.bf16.mxu0 %v3938_v15 }
  0xdf   : > { %3294 = vmatprep.mubr.msk.f32.mxu0 %vm382_vm0, %v357_v43 }
  0xe1   : > { %3941 = vmatpush3.bf16.msra.mxu0 %v3938_v15 }
  0xe2   : > { %3295 = vmatmul.mubr.msk.f32.gmra.mrb[16].mxu0 %vm382_vm0, %v358_v44  ;;  %3943 = vmatprep.subr.bf16.mxu0 %v3942_v18 }
  0xe3   : > { %3297 = vmatprep.mubr.msk.f32.mxu0 %vm382_vm0, %v359_v45 }
  0xe5   : > { %3945 = vmatpush3.bf16.msra.mxu0 %v3942_v18 }
  0xe6   : > { %3298 = vmatmul.mubr.msk.f32.gmra.mrb[18].mxu0 %vm382_vm0, %v360_v46  ;;  %3947 = vmatprep.subr.bf16.mxu0 %v3946_v21 }
  0xe7   : > { %3300 = vmatprep.mubr.msk.f32.mxu0 %vm382_vm0, %v361_v47 }
  0xe9   : > { %3949 = vmatpush3.bf16.msra.mxu0 %v3946_v21 }
  0xea   : > { %3301 = vmatmul.mubr.msk.f32.gmra.mrb[20].mxu0 %vm382_vm0, %v362_v48 }
  0xeb   : > { %3303 = vmatprep.mubr.msk.f32.mxu0 %vm382_vm0, %v363_v49 }
  0xee   : > { %3304 = vmatmul.mubr.msk.f32.gmra.mrb[22].mxu0 %vm382_vm0, %v364_v50 }
  0xef   : > { %3306 = vmatprep.mubr.msk.f32.mxu0 %vm382_vm0, %v365_v51 }
  0xf2   : > { %3307 = vmatmul.mubr.msk.f32.gmra.mrb[24].mxu0 %vm382_vm0, %v366_v52 }
  0xf3   : > { %3309 = vmatprep.mubr.msk.f32.mxu0 %vm382_vm0, %v367_v53 }
  0xf6   : > { %3310 = vmatmul.mubr.msk.f32.gmra.mrb[26].mxu0 %vm382_vm0, %v368_v54 }
  0xf7   : > { %3312 = vmatprep.mubr.msk.f32.mxu0 %vm382_vm0, %v369_v55 }
  0xfa   : > { %3313 = vmatmul.mubr.msk.f32.gmra.mrb[28].mxu0 %vm382_vm0, %v370_v56 }
  0xfb   : > { %3315 = vmatprep.mubr.msk.f32.mxu0 %vm382_vm0, %v371_v57 }
  0xfe   : > { %3316 = vmatmul.mubr.msk.f32.gmra.mrb[30].mxu0 %vm382_vm0, %v372_v58 }
 0x195   : > { %v3272_v23 = vpop.f32.mrb[0].mxu0 }
 0x196   : > { %v551_v24 = vadd.f32 %v3272_v23, %v4918_v22  ;;  %v545_v25 = vpop.f32.mrb[1].mxu0 }
 0x197   : > { %v546_v26 = vadd.f32 %v4918_v22, %v545_v25 }
 0x198   : > { %v705_v29 = vmax.f32 %v551_v24, 0.0 }
 0x199   : > { %v3275_v27 = vpop.f32.mrb[2].mxu0  ;;  %v704_v28 = vmax.f32 %v546_v26, 0.0 }
 0x19a   : > { %v561_v30 = vadd.f32 %v3275_v27, %v4918_v22  ;;  %v555_v31 = vpop.f32.mrb[3].mxu0 }
 0x19b   : > { %v556_v32 = vadd.f32 %v4918_v22, %v555_v31  ;;  %3350 = vmatprep.mubr.f32.mxu1 %v704_v28 }
 0x19c   : > { %3351 = vmatmul.mubr.f32.vlgmr.msra.gmra.mrb[0].mxu1 %v705_v29  ;;  %v707_v35 = vmax.f32 %v561_v30, 0.0 }
 0x19d   : > { %v706_v33 = vmax.f32 %v556_v32, 0.0  ;;  %v3278_v34 = vpop.f32.mrb[4].mxu0 }
 0x19e   : > { %v571_v36 = vadd.f32 %v3278_v34, %v4918_v22  ;;  %v565_v37 = vpop.f32.mrb[5].mxu0 }
 0x19f   : > { %v566_v38 = vadd.f32 %v4918_v22, %v565_v37  ;;  %3353 = vmatprep.mubr.f32.mxu1 %v706_v33 }
 0x1a0   : > { %3354 = vmatmul.mubr.f32.gmra.mrb[2].mxu1 %v707_v35  ;;  %v709_v41 = vmax.f32 %v571_v36, 0.0 }
 0x1a1   : > { %v708_v39 = vmax.f32 %v566_v38, 0.0  ;;  %v3281_v40 = vpop.f32.mrb[6].mxu0 }
 0x1a2   : > { %v581_v42 = vadd.f32 %v3281_v40, %v4918_v22  ;;  %v575_v43 = vpop.f32.mrb[7].mxu0 }
 0x1a3   : > { %v576_v44 = vadd.f32 %v4918_v22, %v575_v43  ;;  %3356 = vmatprep.mubr.f32.mxu1 %v708_v39 }
 0x1a4   : > { %3357 = vmatmul.mubr.f32.gmra.mrb[4].mxu1 %v709_v41  ;;  %v711_v47 = vmax.f32 %v581_v42, 0.0 }
 0x1a5   : > { %v710_v45 = vmax.f32 %v576_v44, 0.0  ;;  %v3284_v46 = vpop.f32.mrb[8].mxu0 }
 0x1a6   : > { %v591_v48 = vadd.f32 %v3284_v46, %v4918_v22  ;;  %v585_v49 = vpop.f32.mrb[9].mxu0 }
 0x1a7   : > { %v586_v50 = vadd.f32 %v4918_v22, %v585_v49  ;;  %3359 = vmatprep.mubr.f32.mxu1 %v710_v45 }
 0x1a8   : > { %3360 = vmatmul.mubr.f32.gmra.mrb[6].mxu1 %v711_v47  ;;  %v713_v53 = vmax.f32 %v591_v48, 0.0 }
 0x1a9   : > { %v712_v51 = vmax.f32 %v586_v50, 0.0  ;;  %v3287_v52 = vpop.f32.mrb[10].mxu0 }
 0x1aa   : > { %v601_v54 = vadd.f32 %v3287_v52, %v4918_v22  ;;  %v595_v55 = vpop.f32.mrb[11].mxu0 }
 0x1ab   : > { %v596_v56 = vadd.f32 %v4918_v22, %v595_v55  ;;  %3362 = vmatprep.mubr.f32.mxu1 %v712_v51 }
 0x1ac   : > { %3363 = vmatmul.mubr.f32.gmra.mrb[8].mxu1 %v713_v53  ;;  %v715_v59 = vmax.f32 %v601_v54, 0.0 }
 0x1ad   : > { %v714_v57 = vmax.f32 %v596_v56, 0.0  ;;  %v3290_v58 = vpop.f32.mrb[12].mxu0  ;;  %v1294_v56 = vld [vmem:[#allocation7 + $0x100] sm:$0xff] }
 0x1ae   : > { %v611_v60 = vadd.f32 %v3290_v58, %v4918_v22  ;;  %v605_v61 = vpop.f32.mrb[13].mxu0  ;;  %v1296_v58 = vld [vmem:[#allocation7 + $0x110] sm:$0xff] }
 0x1af   : > { %v606_v62 = vadd.f32 %v4918_v22, %v605_v61  ;;  %3365 = vmatprep.mubr.f32.mxu1 %v714_v57  ;;  %v1295_v57 = vld [vmem:[#allocation7 + $0x108] sm:$0xff] }
 0x1b0   : > { %3366 = vmatmul.mubr.f32.gmra.mrb[10].mxu1 %v715_v59  ;;  %v717_v1 = vmax.f32 %v611_v60, 0.0  ;;  %v3950_v59 = vpack.c.bf16 %v1295_v57, %v1294_v56  ;;  %v1297_v60 = vld [vmem:[#allocation7 + $0x118] sm:$0xff] }
 0x1b1   : > { %v716_v63 = vmax.f32 %v606_v62, 0.0  ;;  %v3293_v0 = vpop.f32.mrb[14].mxu0  ;;  %v3954_v61 = vpack.c.bf16 %v1297_v60, %v1296_v58  ;;  %v1298_v62 = vld [vmem:[#allocation7 + $0x120] sm:$0xff] }
 0x1b2   : > { %v621_v2 = vadd.f32 %v3293_v0, %v4918_v22  ;;  %v615_v3 = vpop.f32.mrb[15].mxu0  ;;  %3951 = vmatprep.subr.bf16.mxu1 %v3950_v59 }
 0x1b3   : > { %v616_v4 = vadd.f32 %v4918_v22, %v615_v3  ;;  %3368 = vmatprep.mubr.f32.mxu1 %v716_v63  ;;  %v1299_v63 = vld [vmem:[#allocation7 + $0x128] sm:$0xff]  ;;  %3953 = vmatpush3.bf16.msra.mxu1 %v3950_v59  ;;  %v1302_v3 = vld [vmem:[#allocation7 + $0x140] sm:$0xff] }
 0x1b4   : > { %3369 = vmatmul.mubr.f32.gmra.mrb[12].mxu1 %v717_v1  ;;  %v719_v7 = vmax.f32 %v621_v2, 0.0  ;;  %3955 = vmatprep.subr.bf16.mxu1 %v3954_v61  ;;  %v3958_v0 = vpack.c.bf16 %v1299_v63, %v1298_v62  ;;  %v1300_v1 = vld [vmem:[#allocation7 + $0x130] sm:$0xff] }
 0x1b5   : > { %v718_v5 = vmax.f32 %v616_v4, 0.0  ;;  %v3296_v6 = vpop.f32.mrb[16].mxu0  ;;  %v1303_v4 = vld [vmem:[#allocation7 + $0x148] sm:$0xff] }
 0x1b6   : > { %v631_v8 = vadd.f32 %v3296_v6, %v4918_v22  ;;  %v625_v9 = vpop.f32.mrb[17].mxu0  ;;  %v1304_v6 = vld [vmem:[#allocation7 + $0x150] sm:$0xff] }
 0x1b7   : > { %v626_v10 = vadd.f32 %v4918_v22, %v625_v9  ;;  %3371 = vmatprep.mubr.f32.mxu1 %v718_v5  ;;  %3957 = vmatpush3.bf16.msra.mxu1 %v3954_v61  ;;  %v3966_v5 = vpack.c.bf16 %v1303_v4, %v1302_v3  ;;  %v1306_v9 = vld [vmem:[#allocation7 + $0x160] sm:$0xff] }
 0x1b8   : > { %3372 = vmatmul.mubr.f32.gmra.mrb[14].mxu1 %v719_v7  ;;  %v721_v13 = vmax.f32 %v631_v8, 0.0  ;;  %3959 = vmatprep.subr.bf16.mxu1 %v3958_v0  ;;  %v1305_v7 = vld [vmem:[#allocation7 + $0x158] sm:$0xff] }
 0x1b9   : > { %v720_v11 = vmax.f32 %v626_v10, 0.0  ;;  %v3299_v12 = vpop.f32.mrb[18].mxu0  ;;  %v3970_v8 = vpack.c.bf16 %v1305_v7, %v1304_v6  ;;  %v1307_v10 = vld [vmem:[#allocation7 + $0x168] sm:$0xff] }
 0x1ba   : > { %v641_v14 = vadd.f32 %v3299_v12, %v4918_v22  ;;  %v635_v15 = vpop.f32.mrb[19].mxu0  ;;  %v1308_v12 = vld [vmem:[#allocation7 + $0x170] sm:$0xff] }
 0x1bb   : > { %v636_v16 = vadd.f32 %v4918_v22, %v635_v15  ;;  %3374 = vmatprep.mubr.f32.mxu1 %v720_v11  ;;  %3961 = vmatpush3.bf16.msra.mxu1 %v3958_v0  ;;  %v3974_v11 = vpack.c.bf16 %v1307_v10, %v1306_v9  ;;  %v4952_v15 = vld [vmem:[#allocation10 + $0x1] ss:$0 sm:$0xff] }
 0x1bc   : > { %3375 = vmatmul.mubr.f32.gmra.mrb[16].mxu1 %v721_v13  ;;  %v723_v19 = vmax.f32 %v641_v14, 0.0  ;;  %v1309_v13 = vld [vmem:[#allocation7 + $0x178] sm:$0xff] }
 0x1bd   : > { %v722_v17 = vmax.f32 %v636_v16, 0.0  ;;  %v3302_v18 = vpop.f32.mrb[20].mxu0  ;;  %v3978_v14 = vpack.c.bf16 %v1309_v13, %v1308_v12 }
 0x1be   : > { %v651_v20 = vadd.f32 %v3302_v18, %v4918_v22  ;;  %v645_v21 = vpop.f32.mrb[21].mxu0 }
 0x1bf   : > { %v646_v23 = vadd.f32 %v4918_v22, %v645_v21  ;;  %3377 = vmatprep.mubr.f32.mxu1 %v722_v17 }
 0x1c0   : > { %3378 = vmatmul.mubr.f32.gmra.mrb[18].mxu1 %v723_v19  ;;  %v725_v26 = vmax.f32 %v651_v20, 0.0 }
 0x1c1   : > { %v724_v24 = vmax.f32 %v646_v23, 0.0  ;;  %v3305_v25 = vpop.f32.mrb[22].mxu0 }
 0x1c2   : > { %v661_v27 = vadd.f32 %v3305_v25, %v4918_v22  ;;  %v655_v28 = vpop.f32.mrb[23].mxu0 }
 0x1c3   : > { %v656_v29 = vadd.f32 %v4918_v22, %v655_v28  ;;  %3380 = vmatprep.mubr.f32.mxu1 %v724_v24 }
 0x1c4   : > { %3381 = vmatmul.mubr.f32.gmra.mrb[20].mxu1 %v725_v26  ;;  %v727_v32 = vmax.f32 %v661_v27, 0.0 }
 0x1c5   : > { %v726_v30 = vmax.f32 %v656_v29, 0.0  ;;  %v3308_v31 = vpop.f32.mrb[24].mxu0 }
 0x1c6   : > { %v671_v33 = vadd.f32 %v3308_v31, %v4918_v22  ;;  %v665_v34 = vpop.f32.mrb[25].mxu0 }
 0x1c7   : > { %v666_v35 = vadd.f32 %v4918_v22, %v665_v34  ;;  %3383 = vmatprep.mubr.f32.mxu1 %v726_v30 }
 0x1c8   : > { %3384 = vmatmul.mubr.f32.gmra.mrb[22].mxu1 %v727_v32  ;;  %v729_v38 = vmax.f32 %v671_v33, 0.0 }
 0x1c9   : > { %v728_v36 = vmax.f32 %v666_v35, 0.0  ;;  %v3311_v37 = vpop.f32.mrb[26].mxu0 }
 0x1ca   : > { %v681_v39 = vadd.f32 %v3311_v37, %v4918_v22  ;;  %v675_v40 = vpop.f32.mrb[27].mxu0 }
 0x1cb   : > { %v676_v41 = vadd.f32 %v4918_v22, %v675_v40  ;;  %3386 = vmatprep.mubr.f32.mxu1 %v728_v36 }
 0x1cc   : > { %3387 = vmatmul.mubr.f32.gmra.mrb[24].mxu1 %v729_v38  ;;  %v731_v44 = vmax.f32 %v681_v39, 0.0 }
 0x1cd   : > { %v730_v42 = vmax.f32 %v676_v41, 0.0  ;;  %v3314_v43 = vpop.f32.mrb[28].mxu0 }
 0x1ce   : > { %v691_v45 = vadd.f32 %v3314_v43, %v4918_v22  ;;  %v685_v46 = vpop.f32.mrb[29].mxu0 }
 0x1cf   : > { %v686_v47 = vadd.f32 %v4918_v22, %v685_v46  ;;  %3389 = vmatprep.mubr.f32.mxu1 %v730_v42 }
 0x1d0   : > { %3390 = vmatmul.mubr.f32.gmra.mrb[26].mxu1 %v731_v44  ;;  %v733_v50 = vmax.f32 %v691_v45, 0.0 }
 0x1d1   : > { %v732_v48 = vmax.f32 %v686_v47, 0.0  ;;  %v3317_v49 = vpop.f32.mrb[30].mxu0 }
 0x1d2   : > { %v701_v51 = vadd.f32 %v3317_v49, %v4918_v22  ;;  %v695_v52 = vpop.f32.mrb[31].mxu0 }
 0x1d3   : > { %v696_v53 = vadd.f32 %v4918_v22, %v695_v52  ;;  %3392 = vmatprep.mubr.f32.mxu1 %v732_v48  ;;  %v1301_v22 = vld [vmem:[#allocation7 + $0x138] sm:$0xff] }
 0x1d4   : > { %3393 = vmatmul.mubr.f32.gmra.mrb[28].mxu1 %v733_v50  ;;  %v735_v55 = vmax.f32 %v701_v51, 0.0  ;;  %v3962_v2 = vpack.c.bf16 %v1301_v22, %v1300_v1 }
 0x1d5   : > { %v734_v54 = vmax.f32 %v696_v53, 0.0 }
 0x1d6   : > { %3963 = vmatprep.subr.bf16.mxu1 %v3962_v2 }
 0x1d7   : > { %3395 = vmatprep.mubr.f32.mxu1 %v734_v54  ;;  %3965 = vmatpush3.bf16.msra.mxu1 %v3962_v2 }
 0x1d8   : > { %3396 = vmatmul.mubr.f32.gmra.mrb[30].mxu1 %v735_v55  ;;  %3967 = vmatprep.subr.bf16.mxu1 %v3966_v5 }
 0x1db   : > { %3969 = vmatpush3.bf16.msra.mxu1 %v3966_v5 }
 0x1dc   : > { %3971 = vmatprep.subr.bf16.mxu1 %v3970_v8 }
 0x1df   : > { %3973 = vmatpush3.bf16.msra.mxu1 %v3970_v8 }
 0x1e0   : > { %3975 = vmatprep.subr.bf16.mxu1 %v3974_v11 }
 0x1e3   : > { %3977 = vmatpush3.bf16.msra.mxu1 %v3974_v11 }
 0x1e4   : > { %3979 = vmatprep.subr.bf16.mxu1 %v3978_v14 }
 0x1e7   : > { %3981 = vmatpush3.bf16.msra.mxu1 %v3978_v14 }
 0x26f   : > { %v3352_v16 = vpop.f32.mrb[0].mxu1 }
 0x270   : > { %v829_v17 = vadd.f32 %v3352_v16, %v4952_v15  ;;  %v823_v18 = vpop.f32.mrb[1].mxu1 }
 0x271   : > { %v824_v19 = vadd.f32 %v4952_v15, %v823_v18 }
 0x272   : > { %v983_v23 = vmax.f32 %v829_v17, 0.0 }
 0x273   : > { %v982_v20 = vmax.f32 %v824_v19, 0.0  ;;  %v3355_v21 = vpop.f32.mrb[2].mxu1 }
 0x274   : > { %v839_v24 = vadd.f32 %v3355_v21, %v4952_v15  ;;  %v833_v25 = vpop.f32.mrb[3].mxu1 }
 0x275   : > { %v834_v26 = vadd.f32 %v4952_v15, %v833_v25  ;;  %3430 = vmatprep.mubr.f32.mxu0 %v982_v20 }
 0x276   : > { %3431 = vmatmul.mubr.f32.vlgmr.msra.gmra.mrb[32].mxu0 %v983_v23  ;;  %v985_v29 = vmax.f32 %v839_v24, 0.0 }
 0x277   : > { %v984_v27 = vmax.f32 %v834_v26, 0.0  ;;  %v3358_v28 = vpop.f32.mrb[4].mxu1 }
 0x278   : > { %v849_v30 = vadd.f32 %v3358_v28, %v4952_v15  ;;  %v843_v31 = vpop.f32.mrb[5].mxu1 }
 0x279   : > { %v844_v32 = vadd.f32 %v4952_v15, %v843_v31  ;;  %3433 = vmatprep.mubr.f32.mxu0 %v984_v27 }
 0x27a   : > { %3434 = vmatmul.mubr.f32.gmra.mrb[34].mxu0 %v985_v29  ;;  %v987_v35 = vmax.f32 %v849_v30, 0.0 }
 0x27b   : > { %v986_v33 = vmax.f32 %v844_v32, 0.0  ;;  %v3361_v34 = vpop.f32.mrb[6].mxu1 }
 0x27c   : > { %v859_v36 = vadd.f32 %v3361_v34, %v4952_v15  ;;  %v853_v37 = vpop.f32.mrb[7].mxu1 }
 0x27d   : > { %v854_v38 = vadd.f32 %v4952_v15, %v853_v37  ;;  %3436 = vmatprep.mubr.f32.mxu0 %v986_v33 }
 0x27e   : > { %3437 = vmatmul.mubr.f32.gmra.mrb[36].mxu0 %v987_v35  ;;  %v989_v41 = vmax.f32 %v859_v36, 0.0 }
 0x27f   : > { %v988_v39 = vmax.f32 %v854_v38, 0.0  ;;  %v3364_v40 = vpop.f32.mrb[8].mxu1 }
 0x280   : > { %v869_v42 = vadd.f32 %v3364_v40, %v4952_v15  ;;  %v863_v43 = vpop.f32.mrb[9].mxu1 }
 0x281   : > { %v864_v44 = vadd.f32 %v4952_v15, %v863_v43  ;;  %3439 = vmatprep.mubr.f32.mxu0 %v988_v39 }
 0x282   : > { %3440 = vmatmul.mubr.f32.gmra.mrb[38].mxu0 %v989_v41  ;;  %v991_v47 = vmax.f32 %v869_v42, 0.0 }
 0x283   : > { %v990_v45 = vmax.f32 %v864_v44, 0.0  ;;  %v3367_v46 = vpop.f32.mrb[10].mxu1 }
 0x284   : > { %v879_v48 = vadd.f32 %v3367_v46, %v4952_v15  ;;  %v873_v49 = vpop.f32.mrb[11].mxu1 }
 0x285   : > { %v874_v50 = vadd.f32 %v4952_v15, %v873_v49  ;;  %3442 = vmatprep.mubr.f32.mxu0 %v990_v45 }
 0x286   : > { %3443 = vmatmul.mubr.f32.gmra.mrb[40].mxu0 %v991_v47  ;;  %v993_v53 = vmax.f32 %v879_v48, 0.0 }
 0x287   : > { %v992_v51 = vmax.f32 %v874_v50, 0.0  ;;  %v3370_v52 = vpop.f32.mrb[12].mxu1  ;;  %v1541_v50 = vld [vmem:[#allocation7 + $0x180] sm:$0xff] }
 0x288   : > { %v889_v54 = vadd.f32 %v3370_v52, %v4952_v15  ;;  %v883_v55 = vpop.f32.mrb[13].mxu1  ;;  %v1543_v52 = vld [vmem:[#allocation7 + $0x190] sm:$0xff] }
 0x289   : > { %v884_v56 = vadd.f32 %v4952_v15, %v883_v55  ;;  %3445 = vmatprep.mubr.f32.mxu0 %v992_v51  ;;  %v1542_v51 = vld [vmem:[#allocation7 + $0x188] sm:$0xff] }
 0x28a   : > { %3446 = vmatmul.mubr.f32.gmra.mrb[42].mxu0 %v993_v53  ;;  %v995_v59 = vmax.f32 %v889_v54, 0.0  ;;  %v3982_v53 = vpack.c.bf16 %v1542_v51, %v1541_v50  ;;  %v1544_v54 = vld [vmem:[#allocation7 + $0x198] sm:$0xff] }
 0x28b   : > { %v994_v57 = vmax.f32 %v884_v56, 0.0  ;;  %v3373_v58 = vpop.f32.mrb[14].mxu1  ;;  %v3986_v55 = vpack.c.bf16 %v1544_v54, %v1543_v52  ;;  %v1545_v56 = vld [vmem:[#allocation7 + $0x1a0] sm:$0xff] }
 0x28c   : > { %v899_v60 = vadd.f32 %v3373_v58, %v4952_v15  ;;  %v893_v61 = vpop.f32.mrb[15].mxu1  ;;  %3983 = vmatprep.subr.bf16.mxu0 %v3982_v53 }
 0x28d   : > { %v894_v62 = vadd.f32 %v4952_v15, %v893_v61  ;;  %3448 = vmatprep.mubr.f32.mxu0 %v994_v57  ;;  %v1546_v57 = vld [vmem:[#allocation7 + $0x1a8] sm:$0xff]  ;;  %3985 = vmatpush3.bf16.msra.mxu0 %v3982_v53  ;;  %v1549_v61 = vld [vmem:[#allocation7 + $0x1c0] sm:$0xff] }
 0x28e   : > { %3449 = vmatmul.mubr.f32.gmra.mrb[44].mxu0 %v995_v59  ;;  %v997_v1 = vmax.f32 %v899_v60, 0.0  ;;  %3987 = vmatprep.subr.bf16.mxu0 %v3986_v55  ;;  %v3990_v58 = vpack.c.bf16 %v1546_v57, %v1545_v56  ;;  %v1547_v59 = vld [vmem:[#allocation7 + $0x1b0] sm:$0xff] }
 0x28f   : > { %v996_v63 = vmax.f32 %v894_v62, 0.0  ;;  %v3376_v0 = vpop.f32.mrb[16].mxu1  ;;  %v1550_v62 = vld [vmem:[#allocation7 + $0x1c8] sm:$0xff] }
 0x290   : > { %v909_v22 = vadd.f32 %v3376_v0, %v4952_v15  ;;  %v903_v2 = vpop.f32.mrb[17].mxu1  ;;  %v1551_v0 = vld [vmem:[#allocation7 + $0x1d0] sm:$0xff] }
 0x291   : > { %v904_v3 = vadd.f32 %v4952_v15, %v903_v2  ;;  %3451 = vmatprep.mubr.f32.mxu0 %v996_v63  ;;  %3989 = vmatpush3.bf16.msra.mxu0 %v3986_v55  ;;  %v3998_v63 = vpack.c.bf16 %v1550_v62, %v1549_v61  ;;  %v1553_v2 = vld [vmem:[#allocation7 + $0x1e0] sm:$0xff] }
 0x292   : > { %3452 = vmatmul.mubr.f32.gmra.mrb[46].mxu0 %v997_v1  ;;  %v999_v6 = vmax.f32 %v909_v22, 0.0  ;;  %3991 = vmatprep.subr.bf16.mxu0 %v3990_v58  ;;  %v1552_v1 = vld [vmem:[#allocation7 + $0x1d8] sm:$0xff] }
 0x293   : > { %v998_v4 = vmax.f32 %v904_v3, 0.0  ;;  %v3379_v5 = vpop.f32.mrb[18].mxu1  ;;  %v4002_v22 = vpack.c.bf16 %v1552_v1, %v1551_v0  ;;  %v1554_v3 = vld [vmem:[#allocation7 + $0x1e8] sm:$0xff] }
 0x294   : > { %v919_v7 = vadd.f32 %v3379_v5, %v4952_v15  ;;  %v913_v8 = vpop.f32.mrb[19].mxu1  ;;  %v1555_v5 = vld [vmem:[#allocation7 + $0x1f0] sm:$0xff] }
 0x295   : > { %v914_v9 = vadd.f32 %v4952_v15, %v913_v8  ;;  %3454 = vmatprep.mubr.f32.mxu0 %v998_v4  ;;  %3993 = vmatpush3.bf16.msra.mxu0 %v3990_v58  ;;  %v4006_v4 = vpack.c.bf16 %v1554_v3, %v1553_v2  ;;  %v4986_v8 = vld [vmem:[#allocation10 + $0x2] ss:$0 sm:$0xff] }
 0x296   : > { %3455 = vmatmul.mubr.f32.gmra.mrb[48].mxu0 %v999_v6  ;;  %v1001_v12 = vmax.f32 %v919_v7, 0.0  ;;  %v1556_v6 = vld [vmem:[#allocation7 + $0x1f8] sm:$0xff] }
 0x297   : > { %v1000_v10 = vmax.f32 %v914_v9, 0.0  ;;  %v3382_v11 = vpop.f32.mrb[20].mxu1  ;;  %v4010_v7 = vpack.c.bf16 %v1556_v6, %v1555_v5 }
 0x298   : > { %v929_v13 = vadd.f32 %v3382_v11, %v4952_v15  ;;  %v923_v14 = vpop.f32.mrb[21].mxu1 }
 0x299   : > { %v924_v16 = vadd.f32 %v4952_v15, %v923_v14  ;;  %3457 = vmatprep.mubr.f32.mxu0 %v1000_v10 }
 0x29a   : > { %3458 = vmatmul.mubr.f32.gmra.mrb[50].mxu0 %v1001_v12  ;;  %v1003_v19 = vmax.f32 %v929_v13, 0.0 }
 0x29b   : > { %v1002_v17 = vmax.f32 %v924_v16, 0.0  ;;  %v3385_v18 = vpop.f32.mrb[22].mxu1 }
 0x29c   : > { %v939_v20 = vadd.f32 %v3385_v18, %v4952_v15  ;;  %v933_v21 = vpop.f32.mrb[23].mxu1 }
 0x29d   : > { %v934_v23 = vadd.f32 %v4952_v15, %v933_v21  ;;  %3460 = vmatprep.mubr.f32.mxu0 %v1002_v17 }
 0x29e   : > { %3461 = vmatmul.mubr.f32.gmra.mrb[52].mxu0 %v1003_v19  ;;  %v1005_v26 = vmax.f32 %v939_v20, 0.0 }
 0x29f   : > { %v1004_v24 = vmax.f32 %v934_v23, 0.0  ;;  %v3388_v25 = vpop.f32.mrb[24].mxu1 }
 0x2a0   : > { %v949_v27 = vadd.f32 %v3388_v25, %v4952_v15  ;;  %v943_v28 = vpop.f32.mrb[25].mxu1 }
 0x2a1   : > { %v944_v29 = vadd.f32 %v4952_v15, %v943_v28  ;;  %3463 = vmatprep.mubr.f32.mxu0 %v1004_v24 }
 0x2a2   : > { %3464 = vmatmul.mubr.f32.gmra.mrb[54].mxu0 %v1005_v26  ;;  %v1007_v32 = vmax.f32 %v949_v27, 0.0 }
 0x2a3   : > { %v1006_v30 = vmax.f32 %v944_v29, 0.0  ;;  %v3391_v31 = vpop.f32.mrb[26].mxu1 }
 0x2a4   : > { %v959_v33 = vadd.f32 %v3391_v31, %v4952_v15  ;;  %v953_v34 = vpop.f32.mrb[27].mxu1 }
 0x2a5   : > { %v954_v35 = vadd.f32 %v4952_v15, %v953_v34  ;;  %3466 = vmatprep.mubr.f32.mxu0 %v1006_v30 }
 0x2a6   : > { %3467 = vmatmul.mubr.f32.gmra.mrb[56].mxu0 %v1007_v32  ;;  %v1009_v38 = vmax.f32 %v959_v33, 0.0 }
 0x2a7   : > { %v1008_v36 = vmax.f32 %v954_v35, 0.0  ;;  %v3394_v37 = vpop.f32.mrb[28].mxu1 }
 0x2a8   : > { %v969_v39 = vadd.f32 %v3394_v37, %v4952_v15  ;;  %v963_v40 = vpop.f32.mrb[29].mxu1 }
 0x2a9   : > { %v964_v41 = vadd.f32 %v4952_v15, %v963_v40  ;;  %3469 = vmatprep.mubr.f32.mxu0 %v1008_v36 }
 0x2aa   : > { %3470 = vmatmul.mubr.f32.gmra.mrb[58].mxu0 %v1009_v38  ;;  %v1011_v44 = vmax.f32 %v969_v39, 0.0 }
 0x2ab   : > { %v1010_v42 = vmax.f32 %v964_v41, 0.0  ;;  %v3397_v43 = vpop.f32.mrb[30].mxu1 }
 0x2ac   : > { %v979_v45 = vadd.f32 %v3397_v43, %v4952_v15  ;;  %v973_v46 = vpop.f32.mrb[31].mxu1 }
 0x2ad   : > { %v974_v47 = vadd.f32 %v4952_v15, %v973_v46  ;;  %3472 = vmatprep.mubr.f32.mxu0 %v1010_v42  ;;  %v1548_v15 = vld [vmem:[#allocation7 + $0x1b8] sm:$0xff] }
 0x2ae   : > { %3473 = vmatmul.mubr.f32.gmra.mrb[60].mxu0 %v1011_v44  ;;  %v1013_v49 = vmax.f32 %v979_v45, 0.0  ;;  %v3994_v60 = vpack.c.bf16 %v1548_v15, %v1547_v59 }
 0x2af   : > { %v1012_v48 = vmax.f32 %v974_v47, 0.0 }
 0x2b0   : > { %3995 = vmatprep.subr.bf16.mxu0 %v3994_v60 }
 0x2b1   : > { %3475 = vmatprep.mubr.f32.mxu0 %v1012_v48  ;;  %3997 = vmatpush3.bf16.msra.mxu0 %v3994_v60 }
 0x2b2   : > { %3476 = vmatmul.mubr.f32.gmra.mrb[62].mxu0 %v1013_v49  ;;  %3999 = vmatprep.subr.bf16.mxu0 %v3998_v63 }
 0x2b5   : > { %4001 = vmatpush3.bf16.msra.mxu0 %v3998_v63 }
 0x2b6   : > { %4003 = vmatprep.subr.bf16.mxu0 %v4002_v22 }
 0x2b9   : > { %4005 = vmatpush3.bf16.msra.mxu0 %v4002_v22 }
 0x2ba   : > { %4007 = vmatprep.subr.bf16.mxu0 %v4006_v4 }
 0x2bd   : > { %4009 = vmatpush3.bf16.msra.mxu0 %v4006_v4 }
 0x2be   : > { %4011 = vmatprep.subr.bf16.mxu0 %v4010_v7 }
 0x2c1   : > { %4013 = vmatpush3.bf16.msra.mxu0 %v4010_v7 }
 0x349   : > { %v3432_v9 = vpop.f32.mrb[32].mxu0 }
 0x34a   : > { %v1108_v10 = vadd.f32 %v3432_v9, %v4986_v8  ;;  %v1102_v11 = vpop.f32.mrb[33].mxu0 }
 0x34b   : > { %v1103_v12 = vadd.f32 %v4986_v8, %v1102_v11 }
 0x34c   : > { %v1262_v16 = vmax.f32 %v1108_v10, 0.0 }
 0x34d   : > { %v1261_v13 = vmax.f32 %v1103_v12, 0.0  ;;  %v3435_v14 = vpop.f32.mrb[34].mxu0 }
 0x34e   : > { %v1118_v17 = vadd.f32 %v3435_v14, %v4986_v8  ;;  %v1112_v18 = vpop.f32.mrb[35].mxu0 }
 0x34f   : > { %v1113_v19 = vadd.f32 %v4986_v8, %v1112_v18  ;;  %3510 = vmatprep.mubr.f32.mxu1 %v1261_v13 }
 0x350   : > { %3511 = vmatmul.mubr.f32.vlgmr.msra.gmra.mrb[32].mxu1 %v1262_v16  ;;  %v1264_v23 = vmax.f32 %v1118_v17, 0.0 }
 0x351   : > { %v1263_v20 = vmax.f32 %v1113_v19, 0.0  ;;  %v3438_v21 = vpop.f32.mrb[36].mxu0 }
 0x352   : > { %v1128_v24 = vadd.f32 %v3438_v21, %v4986_v8  ;;  %v1122_v25 = vpop.f32.mrb[37].mxu0 }
 0x353   : > { %v1123_v26 = vadd.f32 %v4986_v8, %v1122_v25  ;;  %3513 = vmatprep.mubr.f32.mxu1 %v1263_v20 }
 0x354   : > { %3514 = vmatmul.mubr.f32.gmra.mrb[34].mxu1 %v1264_v23  ;;  %v1266_v29 = vmax.f32 %v1128_v24, 0.0 }
 0x355   : > { %v1265_v27 = vmax.f32 %v1123_v26, 0.0  ;;  %v3441_v28 = vpop.f32.mrb[38].mxu0 }
 0x356   : > { %v1138_v30 = vadd.f32 %v3441_v28, %v4986_v8  ;;  %v1132_v31 = vpop.f32.mrb[39].mxu0 }
 0x357   : > { %v1133_v32 = vadd.f32 %v4986_v8, %v1132_v31  ;;  %3516 = vmatprep.mubr.f32.mxu1 %v1265_v27 }
 0x358   : > { %3517 = vmatmul.mubr.f32.gmra.mrb[36].mxu1 %v1266_v29  ;;  %v1268_v35 = vmax.f32 %v1138_v30, 0.0 }
 0x359   : > { %v1267_v33 = vmax.f32 %v1133_v32, 0.0  ;;  %v3444_v34 = vpop.f32.mrb[40].mxu0 }
 0x35a   : > { %v1148_v36 = vadd.f32 %v3444_v34, %v4986_v8  ;;  %v1142_v37 = vpop.f32.mrb[41].mxu0 }
 0x35b   : > { %v1143_v38 = vadd.f32 %v4986_v8, %v1142_v37  ;;  %3519 = vmatprep.mubr.f32.mxu1 %v1267_v33 }
 0x35c   : > { %3520 = vmatmul.mubr.f32.gmra.mrb[38].mxu1 %v1268_v35  ;;  %v1270_v41 = vmax.f32 %v1148_v36, 0.0 }
 0x35d   : > { %v1269_v39 = vmax.f32 %v1143_v38, 0.0  ;;  %v3447_v40 = vpop.f32.mrb[42].mxu0 }
 0x35e   : > { %v1158_v42 = vadd.f32 %v3447_v40, %v4986_v8  ;;  %v1152_v43 = vpop.f32.mrb[43].mxu0 }
 0x35f   : > { %v1153_v44 = vadd.f32 %v4986_v8, %v1152_v43  ;;  %3522 = vmatprep.mubr.f32.mxu1 %v1269_v39 }
 0x360   : > { %3523 = vmatmul.mubr.f32.gmra.mrb[40].mxu1 %v1270_v41  ;;  %v1272_v47 = vmax.f32 %v1158_v42, 0.0 }
 0x361   : > { %v1271_v45 = vmax.f32 %v1153_v44, 0.0  ;;  %v3450_v46 = vpop.f32.mrb[44].mxu0  ;;  %v1820_v44 = vld [vmem:[#allocation7 + $0x200] sm:$0xff] }
 0x362   : > { %v1168_v48 = vadd.f32 %v3450_v46, %v4986_v8  ;;  %v1162_v49 = vpop.f32.mrb[45].mxu0  ;;  %v1822_v46 = vld [vmem:[#allocation7 + $0x210] sm:$0xff] }
 0x363   : > { %v1163_v50 = vadd.f32 %v4986_v8, %v1162_v49  ;;  %3525 = vmatprep.mubr.f32.mxu1 %v1271_v45  ;;  %v1821_v45 = vld [vmem:[#allocation7 + $0x208] sm:$0xff] }
 0x364   : > { %3526 = vmatmul.mubr.f32.gmra.mrb[42].mxu1 %v1272_v47  ;;  %v1274_v53 = vmax.f32 %v1168_v48, 0.0  ;;  %v4014_v47 = vpack.c.bf16 %v1821_v45, %v1820_v44  ;;  %v1823_v48 = vld [vmem:[#allocation7 + $0x218] sm:$0xff] }
 0x365   : > { %v1273_v51 = vmax.f32 %v1163_v50, 0.0  ;;  %v3453_v52 = vpop.f32.mrb[46].mxu0  ;;  %v4018_v49 = vpack.c.bf16 %v1823_v48, %v1822_v46  ;;  %v1824_v50 = vld [vmem:[#allocation7 + $0x220] sm:$0xff] }
 0x366   : > { %v1178_v54 = vadd.f32 %v3453_v52, %v4986_v8  ;;  %v1172_v55 = vpop.f32.mrb[47].mxu0  ;;  %4015 = vmatprep.subr.bf16.mxu1 %v4014_v47 }
 0x367   : > { %v1173_v56 = vadd.f32 %v4986_v8, %v1172_v55  ;;  %3528 = vmatprep.mubr.f32.mxu1 %v1273_v51  ;;  %v1825_v51 = vld [vmem:[#allocation7 + $0x228] sm:$0xff]  ;;  %4017 = vmatpush3.bf16.msra.mxu1 %v4014_v47  ;;  %v1828_v55 = vld [vmem:[#allocation7 + $0x240] sm:$0xff] }
 0x368   : > { %3529 = vmatmul.mubr.f32.gmra.mrb[44].mxu1 %v1274_v53  ;;  %v1276_v59 = vmax.f32 %v1178_v54, 0.0  ;;  %4019 = vmatprep.subr.bf16.mxu1 %v4018_v49  ;;  %v4022_v52 = vpack.c.bf16 %v1825_v51, %v1824_v50  ;;  %v1826_v53 = vld [vmem:[#allocation7 + $0x230] sm:$0xff] }
 0x369   : > { %v1275_v57 = vmax.f32 %v1173_v56, 0.0  ;;  %v3456_v58 = vpop.f32.mrb[48].mxu0  ;;  %v1829_v56 = vld [vmem:[#allocation7 + $0x248] sm:$0xff] }
 0x36a   : > { %v1188_v15 = vadd.f32 %v3456_v58, %v4986_v8  ;;  %v1182_v60 = vpop.f32.mrb[49].mxu0  ;;  %v1830_v58 = vld [vmem:[#allocation7 + $0x250] sm:$0xff] }
 0x36b   : > { %v1183_v61 = vadd.f32 %v4986_v8, %v1182_v60  ;;  %3531 = vmatprep.mubr.f32.mxu1 %v1275_v57  ;;  %4021 = vmatpush3.bf16.msra.mxu1 %v4018_v49  ;;  %v4030_v57 = vpack.c.bf16 %v1829_v56, %v1828_v55  ;;  %v1832_v60 = vld [vmem:[#allocation7 + $0x260] sm:$0xff] }
 0x36c   : > { %3532 = vmatmul.mubr.f32.gmra.mrb[46].mxu1 %v1276_v59  ;;  %v1278_v0 = vmax.f32 %v1188_v15, 0.0  ;;  %4023 = vmatprep.subr.bf16.mxu1 %v4022_v52  ;;  %v1831_v59 = vld [vmem:[#allocation7 + $0x258] sm:$0xff] }
 0x36d   : > { %v1277_v62 = vmax.f32 %v1183_v61, 0.0  ;;  %v3459_v63 = vpop.f32.mrb[50].mxu0  ;;  %v4034_v15 = vpack.c.bf16 %v1831_v59, %v1830_v58  ;;  %v1833_v61 = vld [vmem:[#allocation7 + $0x268] sm:$0xff] }
 0x36e   : > { %v1198_v1 = vadd.f32 %v3459_v63, %v4986_v8  ;;  %v1192_v22 = vpop.f32.mrb[51].mxu0  ;;  %v1834_v63 = vld [vmem:[#allocation7 + $0x270] sm:$0xff] }
 0x36f   : > { %v1193_v2 = vadd.f32 %v4986_v8, %v1192_v22  ;;  %3534 = vmatprep.mubr.f32.mxu1 %v1277_v62  ;;  %4025 = vmatpush3.bf16.msra.mxu1 %v4022_v52  ;;  %v4038_v62 = vpack.c.bf16 %v1833_v61, %v1832_v60  ;;  %v5020_v22 = vld [vmem:[#allocation10 + $0x3] ss:$0 sm:$0xff] }
 0x370   : > { %3535 = vmatmul.mubr.f32.gmra.mrb[48].mxu1 %v1278_v0  ;;  %v1280_v5 = vmax.f32 %v1198_v1, 0.0  ;;  %v1835_v0 = vld [vmem:[#allocation7 + $0x278] sm:$0xff] }
 0x371   : > { %v1279_v3 = vmax.f32 %v1193_v2, 0.0  ;;  %v3462_v4 = vpop.f32.mrb[52].mxu0  ;;  %v4042_v1 = vpack.c.bf16 %v1835_v0, %v1834_v63 }
 0x372   : > { %v1208_v6 = vadd.f32 %v3462_v4, %v4986_v8  ;;  %v1202_v7 = vpop.f32.mrb[53].mxu0 }
 0x373   : > { %v1203_v9 = vadd.f32 %v4986_v8, %v1202_v7  ;;  %3537 = vmatprep.mubr.f32.mxu1 %v1279_v3 }
 0x374   : > { %3538 = vmatmul.mubr.f32.gmra.mrb[50].mxu1 %v1280_v5  ;;  %v1282_v12 = vmax.f32 %v1208_v6, 0.0 }
 0x375   : > { %v1281_v10 = vmax.f32 %v1203_v9, 0.0  ;;  %v3465_v11 = vpop.f32.mrb[54].mxu0 }
 0x376   : > { %v1218_v13 = vadd.f32 %v3465_v11, %v4986_v8  ;;  %v1212_v14 = vpop.f32.mrb[55].mxu0 }
 0x377   : > { %v1213_v16 = vadd.f32 %v4986_v8, %v1212_v14  ;;  %3540 = vmatprep.mubr.f32.mxu1 %v1281_v10 }
 0x378   : > { %3541 = vmatmul.mubr.f32.gmra.mrb[52].mxu1 %v1282_v12  ;;  %v1284_v19 = vmax.f32 %v1218_v13, 0.0 }
 0x379   : > { %v1283_v17 = vmax.f32 %v1213_v16, 0.0  ;;  %v3468_v18 = vpop.f32.mrb[56].mxu0 }
 0x37a   : > { %v1228_v20 = vadd.f32 %v3468_v18, %v4986_v8  ;;  %v1222_v21 = vpop.f32.mrb[57].mxu0 }
 0x37b   : > { %v1223_v23 = vadd.f32 %v4986_v8, %v1222_v21  ;;  %3543 = vmatprep.mubr.f32.mxu1 %v1283_v17 }
 0x37c   : > { %3544 = vmatmul.mubr.f32.gmra.mrb[54].mxu1 %v1284_v19  ;;  %v1286_v26 = vmax.f32 %v1228_v20, 0.0 }
 0x37d   : > { %v1285_v24 = vmax.f32 %v1223_v23, 0.0  ;;  %v3471_v25 = vpop.f32.mrb[58].mxu0 }
 0x37e   : > { %v1238_v27 = vadd.f32 %v3471_v25, %v4986_v8  ;;  %v1232_v28 = vpop.f32.mrb[59].mxu0 }
 0x37f   : > { %v1233_v29 = vadd.f32 %v4986_v8, %v1232_v28  ;;  %3546 = vmatprep.mubr.f32.mxu1 %v1285_v24 }
 0x380   : > { %3547 = vmatmul.mubr.f32.gmra.mrb[56].mxu1 %v1286_v26  ;;  %v1288_v32 = vmax.f32 %v1238_v27, 0.0 }
 0x381   : > { %v1287_v30 = vmax.f32 %v1233_v29, 0.0  ;;  %v3474_v31 = vpop.f32.mrb[60].mxu0 }
 0x382   : > { %v1248_v33 = vadd.f32 %v3474_v31, %v4986_v8  ;;  %v1242_v34 = vpop.f32.mrb[61].mxu0 }
 0x383   : > { %v1243_v35 = vadd.f32 %v4986_v8, %v1242_v34  ;;  %3549 = vmatprep.mubr.f32.mxu1 %v1287_v30 }
 0x384   : > { %3550 = vmatmul.mubr.f32.gmra.mrb[58].mxu1 %v1288_v32  ;;  %v1290_v38 = vmax.f32 %v1248_v33, 0.0 }
 0x385   : > { %v1289_v36 = vmax.f32 %v1243_v35, 0.0  ;;  %v3477_v37 = vpop.f32.mrb[62].mxu0 }
 0x386   : > { %v1258_v39 = vadd.f32 %v3477_v37, %v4986_v8  ;;  %v1252_v40 = vpop.f32.mrb[63].mxu0 }
 0x387   : > { %v1253_v41 = vadd.f32 %v4986_v8, %v1252_v40  ;;  %3552 = vmatprep.mubr.f32.mxu1 %v1289_v36  ;;  %v1827_v8 = vld [vmem:[#allocation7 + $0x238] sm:$0xff] }
 0x388   : > { %3553 = vmatmul.mubr.f32.gmra.mrb[60].mxu1 %v1290_v38  ;;  %v1292_v43 = vmax.f32 %v1258_v39, 0.0  ;;  %v4026_v54 = vpack.c.bf16 %v1827_v8, %v1826_v53 }
 0x389   : > { %v1291_v42 = vmax.f32 %v1253_v41, 0.0 }
 0x38a   : > { %4027 = vmatprep.subr.bf16.mxu1 %v4026_v54 }
 0x38b   : > { %3555 = vmatprep.mubr.f32.mxu1 %v1291_v42  ;;  %4029 = vmatpush3.bf16.msra.mxu1 %v4026_v54 }
 0x38c   : > { %3556 = vmatmul.mubr.f32.gmra.mrb[62].mxu1 %v1292_v43  ;;  %4031 = vmatprep.subr.bf16.mxu1 %v4030_v57 }
 0x38f   : > { %4033 = vmatpush3.bf16.msra.mxu1 %v4030_v57 }
 0x390   : > { %4035 = vmatprep.subr.bf16.mxu1 %v4034_v15 }
 0x393   : > { %4037 = vmatpush3.bf16.msra.mxu1 %v4034_v15 }
 0x394   : > { %4039 = vmatprep.subr.bf16.mxu1 %v4038_v62 }
 0x397   : > { %4041 = vmatpush3.bf16.msra.mxu1 %v4038_v62 }
 0x398   : > { %4043 = vmatprep.subr.bf16.mxu1 %v4042_v1 }
 0x39b   : > { %4045 = vmatpush3.bf16.msra.mxu1 %v4042_v1 }
 0x423   : > { %v3512_v2 = vpop.f32.mrb[32].mxu1 }
 0x424   : > { %v1381_v3 = vpop.f32.mrb[33].mxu1  ;;  %v1387_v5 = vadd.f32 %v3512_v2, %v5020_v22 }
 0x425   : > { %v1382_v4 = vadd.f32 %v5020_v22, %v1381_v3  ;;  %v2099_v3 = vld [vmem:[#allocation7 + $0x280] sm:$0xff] }
 0x427   : > { %v3515_v6 = vpop.f32.mrb[34].mxu1  ;;  %3590 = vmatprep.mubr.f32.mxu0 %v1382_v4  ;;  %v2100_v4 = vld [vmem:[#allocation7 + $0x288] sm:$0xff] }
 0x428   : > { %v1391_v7 = vpop.f32.mrb[35].mxu1  ;;  %3591 = vmatmul.mubr.f32.vlgmr.msra.gmra.mrb[64].mxu0 %v1387_v5  ;;  %v1397_v10 = vadd.f32 %v3515_v6, %v5020_v22  ;;  %v2101_v5 = vld [vmem:[#allocation7 + $0x290] sm:$0xff]  ;;  %v4046_v6 = vpack.c.bf16 %v2100_v4, %v2099_v3 }
 0x429   : > { %v1392_v9 = vadd.f32 %v5020_v22, %v1391_v7  ;;  %v2102_v7 = vld [vmem:[#allocation7 + $0x298] sm:$0xff] }
 0x42a   : > { %4047 = vmatprep.subr.bf16.mxu0 %v4046_v6 }
 0x42b   : > { %v3518_v11 = vpop.f32.mrb[36].mxu1  ;;  %3593 = vmatprep.mubr.f32.mxu0 %v1392_v9  ;;  %v4050_v9 = vpack.c.bf16 %v2102_v7, %v2101_v5  ;;  %4049 = vmatpush3.bf16.msra.mxu0 %v4046_v6 }
 0x42c   : > { %v1401_v12 = vpop.f32.mrb[37].mxu1  ;;  %3594 = vmatmul.mubr.f32.gmra.mrb[66].mxu0 %v1397_v10  ;;  %v1407_v14 = vadd.f32 %v3518_v11, %v5020_v22  ;;  %v2103_v10 = vld [vmem:[#allocation7 + $0x2a0] sm:$0xff]  ;;  %v2104_v11 = vld [vmem:[#allocation7 + $0x2a8] sm:$0xff] }
 0x42d   : > { %v1402_v13 = vadd.f32 %v5020_v22, %v1401_v12  ;;  %4051 = vmatprep.subr.bf16.mxu0 %v4050_v9  ;;  %v4054_v12 = vpack.c.bf16 %v2104_v11, %v2103_v10 }
 0x42f   : > { %v3521_v16 = vpop.f32.mrb[38].mxu1  ;;  %3596 = vmatprep.mubr.f32.mxu0 %v1402_v13  ;;  %v2105_v13 = vld [vmem:[#allocation7 + $0x2b0] sm:$0xff]  ;;  %4053 = vmatpush3.bf16.msra.mxu0 %v4050_v9 }
 0x430   : > { %v1411_v17 = vpop.f32.mrb[39].mxu1  ;;  %3597 = vmatmul.mubr.f32.gmra.mrb[68].mxu0 %v1407_v14  ;;  %v1417_v19 = vadd.f32 %v3521_v16, %v5020_v22  ;;  %v2106_v14 = vld [vmem:[#allocation7 + $0x2b8] sm:$0xff]  ;;  %4055 = vmatprep.subr.bf16.mxu0 %v4054_v12 }
 0x431   : > { %v1412_v18 = vadd.f32 %v5020_v22, %v1411_v17  ;;  %v4058_v16 = vpack.c.bf16 %v2106_v14, %v2105_v13  ;;  %v2108_v17 = vld [vmem:[#allocation7 + $0x2c8] sm:$0xff] }
 0x433   : > { %v3524_v20 = vpop.f32.mrb[40].mxu1  ;;  %3599 = vmatprep.mubr.f32.mxu0 %v1412_v18  ;;  %4057 = vmatpush3.bf16.msra.mxu0 %v4054_v12 }
 0x434   : > { %v1421_v21 = vpop.f32.mrb[41].mxu1  ;;  %3600 = vmatmul.mubr.f32.gmra.mrb[70].mxu0 %v1417_v19  ;;  %v1427_v24 = vadd.f32 %v3524_v20, %v5020_v22  ;;  %4059 = vmatprep.subr.bf16.mxu0 %v4058_v16  ;;  %v2109_v19 = vld [vmem:[#allocation7 + $0x2d0] sm:$0xff]  ;;  %v2110_v20 = vld [vmem:[#allocation7 + $0x2d8] sm:$0xff] }
 0x435   : > { %v1422_v23 = vadd.f32 %v5020_v22, %v1421_v21  ;;  %v4066_v21 = vpack.c.bf16 %v2110_v20, %v2109_v19 }
 0x437   : > { %v3527_v25 = vpop.f32.mrb[42].mxu1  ;;  %3602 = vmatprep.mubr.f32.mxu0 %v1422_v23  ;;  %4061 = vmatpush3.bf16.msra.mxu0 %v4058_v16  ;;  %v2111_v23 = vld [vmem:[#allocation7 + $0x2e0] sm:$0xff] }
 0x438   : > { %v1431_v26 = vpop.f32.mrb[43].mxu1  ;;  %3603 = vmatmul.mubr.f32.gmra.mrb[72].mxu0 %v1427_v24  ;;  %v1437_v28 = vadd.f32 %v3527_v25, %v5020_v22  ;;  %v2112_v24 = vld [vmem:[#allocation7 + $0x2e8] sm:$0xff] }
 0x439   : > { %v1432_v27 = vadd.f32 %v5020_v22, %v1431_v26  ;;  %v4070_v25 = vpack.c.bf16 %v2112_v24, %v2111_v23  ;;  %v2113_v26 = vld [vmem:[#allocation7 + $0x2f0] sm:$0xff] }
 0x43b   : > { %v3530_v29 = vpop.f32.mrb[44].mxu1  ;;  %3605 = vmatprep.mubr.f32.mxu0 %v1432_v27  ;;  %v2114_v27 = vld [vmem:[#allocation7 + $0x2f8] sm:$0xff] }
 0x43c   : > { %v1441_v30 = vpop.f32.mrb[45].mxu1  ;;  %3606 = vmatmul.mubr.f32.gmra.mrb[74].mxu0 %v1437_v28  ;;  %v1447_v32 = vadd.f32 %v3530_v29, %v5020_v22  ;;  %v4074_v28 = vpack.c.bf16 %v2114_v27, %v2113_v26  ;;  %v5054_v29 = vld [vmem:[#allocation10 + $0x4] ss:$0 sm:$0xff] }
 0x43d   : > { %v1442_v31 = vadd.f32 %v5020_v22, %v1441_v30 }
 0x43f   : > { %v3533_v33 = vpop.f32.mrb[46].mxu1  ;;  %3608 = vmatprep.mubr.f32.mxu0 %v1442_v31 }
 0x440   : > { %v1451_v34 = vpop.f32.mrb[47].mxu1  ;;  %3609 = vmatmul.mubr.f32.gmra.mrb[76].mxu0 %v1447_v32  ;;  %v1457_v36 = vadd.f32 %v3533_v33, %v5020_v22 }
 0x441   : > { %v1452_v35 = vadd.f32 %v5020_v22, %v1451_v34 }
 0x443   : > { %v3536_v37 = vpop.f32.mrb[48].mxu1  ;;  %3611 = vmatprep.mubr.f32.mxu0 %v1452_v35 }
 0x444   : > { %v1461_v38 = vpop.f32.mrb[49].mxu1  ;;  %3612 = vmatmul.mubr.f32.gmra.mrb[78].mxu0 %v1457_v36  ;;  %v1467_v40 = vadd.f32 %v3536_v37, %v5020_v22 }
 0x445   : > { %v1462_v39 = vadd.f32 %v5020_v22, %v1461_v38 }
 0x447   : > { %v3539_v41 = vpop.f32.mrb[50].mxu1  ;;  %3614 = vmatprep.mubr.f32.mxu0 %v1462_v39 }
 0x448   : > { %v1471_v42 = vpop.f32.mrb[51].mxu1  ;;  %3615 = vmatmul.mubr.f32.gmra.mrb[80].mxu0 %v1467_v40  ;;  %v1477_v44 = vadd.f32 %v3539_v41, %v5020_v22 }
 0x449   : > { %v1472_v43 = vadd.f32 %v5020_v22, %v1471_v42 }
 0x44b   : > { %v3542_v45 = vpop.f32.mrb[52].mxu1  ;;  %3617 = vmatprep.mubr.f32.mxu0 %v1472_v43 }
 0x44c   : > { %v1481_v46 = vpop.f32.mrb[53].mxu1  ;;  %3618 = vmatmul.mubr.f32.gmra.mrb[82].mxu0 %v1477_v44  ;;  %v1487_v48 = vadd.f32 %v3542_v45, %v5020_v22 }
 0x44d   : > { %v1482_v47 = vadd.f32 %v5020_v22, %v1481_v46 }
 0x44f   : > { %v3545_v49 = vpop.f32.mrb[54].mxu1  ;;  %3620 = vmatprep.mubr.f32.mxu0 %v1482_v47 }
 0x450   : > { %v1491_v50 = vpop.f32.mrb[55].mxu1  ;;  %3621 = vmatmul.mubr.f32.gmra.mrb[84].mxu0 %v1487_v48  ;;  %v1497_v52 = vadd.f32 %v3545_v49, %v5020_v22 }
 0x451   : > { %v1492_v51 = vadd.f32 %v5020_v22, %v1491_v50 }
 0x453   : > { %v3548_v53 = vpop.f32.mrb[56].mxu1  ;;  %3623 = vmatprep.mubr.f32.mxu0 %v1492_v51 }
 0x454   : > { %v1501_v8 = vpop.f32.mrb[57].mxu1  ;;  %3624 = vmatmul.mubr.f32.gmra.mrb[86].mxu0 %v1497_v52  ;;  %v1507_v55 = vadd.f32 %v3548_v53, %v5020_v22 }
 0x455   : > { %v1502_v54 = vadd.f32 %v5020_v22, %v1501_v8 }
 0x457   : > { %v3551_v56 = vpop.f32.mrb[58].mxu1  ;;  %3626 = vmatprep.mubr.f32.mxu0 %v1502_v54 }
 0x458   : > { %v1511_v57 = vpop.f32.mrb[59].mxu1  ;;  %3627 = vmatmul.mubr.f32.gmra.mrb[88].mxu0 %v1507_v55  ;;  %v1517_v59 = vadd.f32 %v3551_v56, %v5020_v22 }
 0x459   : > { %v1512_v58 = vadd.f32 %v5020_v22, %v1511_v57 }
 0x45b   : > { %v3554_v15 = vpop.f32.mrb[60].mxu1  ;;  %3629 = vmatprep.mubr.f32.mxu0 %v1512_v58 }
 0x45c   : > { %v1521_v60 = vpop.f32.mrb[61].mxu1  ;;  %3630 = vmatmul.mubr.f32.gmra.mrb[90].mxu0 %v1517_v59  ;;  %v1527_v62 = vadd.f32 %v3554_v15, %v5020_v22 }
 0x45d   : > { %v1522_v61 = vadd.f32 %v5020_v22, %v1521_v60 }
 0x45f   : > { %v3557_v63 = vpop.f32.mrb[62].mxu1  ;;  %3632 = vmatprep.mubr.f32.mxu0 %v1522_v61 }
 0x460   : > { %v1531_v0 = vpop.f32.mrb[63].mxu1  ;;  %3633 = vmatmul.mubr.f32.gmra.mrb[92].mxu0 %v1527_v62  ;;  %v1537_v2 = vadd.f32 %v3557_v63, %v5020_v22 }
 0x461   : > { %v1532_v1 = vadd.f32 %v5020_v22, %v1531_v0  ;;  %v2107_v22 = vld [vmem:[#allocation7 + $0x2c0] sm:$0xff] }
 0x462   : > { %v4062_v18 = vpack.c.bf16 %v2108_v17, %v2107_v22 }
 0x463   : > { %3635 = vmatprep.mubr.f32.mxu0 %v1532_v1 }
 0x464   : > { %3636 = vmatmul.mubr.f32.gmra.mrb[94].mxu0 %v1537_v2  ;;  %4063 = vmatprep.subr.bf16.mxu0 %v4062_v18 }
 0x465   : > { %4065 = vmatpush3.bf16.msra.mxu0 %v4062_v18 }
 0x466   : > { %4067 = vmatprep.subr.bf16.mxu0 %v4066_v21 }
 0x469   : > { %4069 = vmatpush3.bf16.msra.mxu0 %v4066_v21 }
 0x46a   : > { %4071 = vmatprep.subr.bf16.mxu0 %v4070_v25 }
 0x46d   : > { %4073 = vmatpush3.bf16.msra.mxu0 %v4070_v25 }
 0x46e   : > { %4075 = vmatprep.subr.bf16.mxu0 %v4074_v28 }
 0x471   : > { %4077 = vmatpush3.bf16.msra.mxu0 %v4074_v28 }
 0x4fb   : > { %v3592_v30 = vpop.f32.mrb[64].mxu0 }
 0x4fc   : > { %v1634_v31 = vadd.f32 %v3592_v30, %v5054_v29  ;;  %v1628_v32 = vpop.f32.mrb[65].mxu0 }
 0x4fd   : > { %v1629_v33 = vadd.f32 %v5054_v29, %v1628_v32 }
 0x4fe   : > { %v1788_v36 = vmax.f32 %v1634_v31, 0.0 }
 0x4ff   : > { %v1787_v34 = vmax.f32 %v1629_v33, 0.0  ;;  %v3595_v35 = vpop.f32.mrb[66].mxu0 }
 0x500   : > { %v1644_v37 = vadd.f32 %v3595_v35, %v5054_v29  ;;  %v1638_v38 = vpop.f32.mrb[67].mxu0 }
 0x501   : > { %v1639_v39 = vadd.f32 %v5054_v29, %v1638_v38  ;;  %3670 = vmatprep.mubr.f32.mxu1 %v1787_v34 }
 0x502   : > { %3671 = vmatmul.mubr.f32.vlgmr.msra.gmra.mrb[64].mxu1 %v1788_v36  ;;  %v1790_v42 = vmax.f32 %v1644_v37, 0.0 }
 0x503   : > { %v1789_v40 = vmax.f32 %v1639_v39, 0.0  ;;  %v3598_v41 = vpop.f32.mrb[68].mxu0 }
 0x504   : > { %v1654_v43 = vadd.f32 %v3598_v41, %v5054_v29  ;;  %v1648_v44 = vpop.f32.mrb[69].mxu0 }
 0x505   : > { %v1649_v45 = vadd.f32 %v5054_v29, %v1648_v44  ;;  %3673 = vmatprep.mubr.f32.mxu1 %v1789_v40 }
 0x506   : > { %3674 = vmatmul.mubr.f32.gmra.mrb[66].mxu1 %v1790_v42  ;;  %v1792_v48 = vmax.f32 %v1654_v43, 0.0 }
 0x507   : > { %v1791_v46 = vmax.f32 %v1649_v45, 0.0  ;;  %v3601_v47 = vpop.f32.mrb[70].mxu0 }
 0x508   : > { %v1664_v49 = vadd.f32 %v3601_v47, %v5054_v29  ;;  %v1658_v50 = vpop.f32.mrb[71].mxu0 }
 0x509   : > { %v1659_v51 = vadd.f32 %v5054_v29, %v1658_v50  ;;  %3676 = vmatprep.mubr.f32.mxu1 %v1791_v46 }
 0x50a   : > { %3677 = vmatmul.mubr.f32.gmra.mrb[68].mxu1 %v1792_v48  ;;  %v1794_v8 = vmax.f32 %v1664_v49, 0.0 }
 0x50b   : > { %v1793_v52 = vmax.f32 %v1659_v51, 0.0  ;;  %v3604_v53 = vpop.f32.mrb[72].mxu0 }
 0x50c   : > { %v1674_v54 = vadd.f32 %v3604_v53, %v5054_v29  ;;  %v1668_v55 = vpop.f32.mrb[73].mxu0 }
 0x50d   : > { %v1669_v56 = vadd.f32 %v5054_v29, %v1668_v55  ;;  %3679 = vmatprep.mubr.f32.mxu1 %v1793_v52 }
 0x50e   : > { %3680 = vmatmul.mubr.f32.gmra.mrb[70].mxu1 %v1794_v8  ;;  %v1796_v59 = vmax.f32 %v1674_v54, 0.0 }
 0x50f   : > { %v1795_v57 = vmax.f32 %v1669_v56, 0.0  ;;  %v3607_v58 = vpop.f32.mrb[74].mxu0 }
 0x510   : > { %v1684_v15 = vadd.f32 %v3607_v58, %v5054_v29  ;;  %v1678_v60 = vpop.f32.mrb[75].mxu0 }
 0x511   : > { %v1679_v61 = vadd.f32 %v5054_v29, %v1678_v60  ;;  %3682 = vmatprep.mubr.f32.mxu1 %v1795_v57 }
 0x512   : > { %3683 = vmatmul.mubr.f32.gmra.mrb[72].mxu1 %v1796_v59  ;;  %v1798_v0 = vmax.f32 %v1684_v15, 0.0 }
 0x513   : > { %v1797_v62 = vmax.f32 %v1679_v61, 0.0  ;;  %v3610_v63 = vpop.f32.mrb[76].mxu0  ;;  %v2377_v61 = vld [vmem:[#allocation8] sm:$0xff] }
 0x514   : > { %v1694_v1 = vadd.f32 %v3610_v63, %v5054_v29  ;;  %v1688_v2 = vpop.f32.mrb[77].mxu0  ;;  %v2379_v63 = vld [vmem:[#allocation8 + $0x10] sm:$0xff] }
 0x515   : > { %v1689_v3 = vadd.f32 %v5054_v29, %v1688_v2  ;;  %3685 = vmatprep.mubr.f32.mxu1 %v1797_v62  ;;  %v2378_v62 = vld [vmem:[#allocation8 + $0x8] sm:$0xff] }
 0x516   : > { %3686 = vmatmul.mubr.f32.gmra.mrb[74].mxu1 %v1798_v0  ;;  %v1800_v6 = vmax.f32 %v1694_v1, 0.0  ;;  %v4078_v0 = vpack.c.bf16 %v2378_v62, %v2377_v61  ;;  %v2380_v1 = vld [vmem:[#allocation8 + $0x18] sm:$0xff] }
 0x517   : > { %v1799_v4 = vmax.f32 %v1689_v3, 0.0  ;;  %v3613_v5 = vpop.f32.mrb[78].mxu0  ;;  %v4082_v2 = vpack.c.bf16 %v2380_v1, %v2379_v63  ;;  %v2381_v3 = vld [vmem:[#allocation8 + $0x20] sm:$0xff] }
 0x518   : > { %v1704_v7 = vadd.f32 %v3613_v5, %v5054_v29  ;;  %v1698_v9 = vpop.f32.mrb[79].mxu0  ;;  %4110 = vmatprep.subr.bf16.mxu1 %v4078_v0  ;;  %4079 = vmatprep.subr.bf16.mxu0 %v4078_v0 }
 0x519   : > { %v1699_v10 = vadd.f32 %v5054_v29, %v1698_v9  ;;  %3688 = vmatprep.mubr.f32.mxu1 %v1799_v4  ;;  %4118 = vmatpush3.bf16.msra.mxu1 %v4078_v0  ;;  %v2382_v4 = vld [vmem:[#allocation8 + $0x28] sm:$0xff]  ;;  %v2385_v9 = vld [vmem:[#allocation8 + $0x40] sm:$0xff] }
 0x51a   : > { %3689 = vmatmul.mubr.f32.gmra.mrb[76].mxu1 %v1800_v6  ;;  %v1802_v13 = vmax.f32 %v1704_v7, 0.0  ;;  %4111 = vmatprep.subr.bf16.mxu1 %v4082_v2  ;;  %v4086_v5 = vpack.c.bf16 %v2382_v4, %v2381_v3  ;;  %v2384_v6 = vld [vmem:[#allocation8 + $0x38] sm:$0xff] }
 0x51b   : > { %v1801_v11 = vmax.f32 %v1699_v10, 0.0  ;;  %v3616_v12 = vpop.f32.mrb[80].mxu0  ;;  %v2386_v10 = vld [vmem:[#allocation8 + $0x48] sm:$0xff] }
 0x51c   : > { %v1714_v14 = vadd.f32 %v3616_v12, %v5054_v29  ;;  %v1708_v16 = vpop.f32.mrb[81].mxu0  ;;  %v2387_v12 = vld [vmem:[#allocation8 + $0x50] sm:$0xff] }
 0x51d   : > { %v1709_v22 = vadd.f32 %v5054_v29, %v1708_v16  ;;  %3691 = vmatprep.mubr.f32.mxu1 %v1801_v11  ;;  %4119 = vmatpush3.bf16.msra.mxu1 %v4082_v2  ;;  %v5091_v11 = vpack.c.bf16 %v2386_v10, %v2385_v9  ;;  %v2389_v16 = vld [vmem:[#allocation8 + $0x60] sm:$0xff] }
 0x51e   : > { %3692 = vmatmul.mubr.f32.gmra.mrb[78].mxu1 %v1802_v13  ;;  %v1804_v19 = vmax.f32 %v1714_v14, 0.0  ;;  %4112 = vmatprep.subr.bf16.mxu1 %v4086_v5  ;;  %v2388_v13 = vld [vmem:[#allocation8 + $0x58] sm:$0xff] }
 0x51f   : > { %v1803_v17 = vmax.f32 %v1709_v22, 0.0  ;;  %v3619_v18 = vpop.f32.mrb[82].mxu0  ;;  %v5095_v14 = vpack.c.bf16 %v2388_v13, %v2387_v12  ;;  %v2390_v22 = vld [vmem:[#allocation8 + $0x68] sm:$0xff] }
 0x520   : > { %v1724_v20 = vadd.f32 %v3619_v18, %v5054_v29  ;;  %v1718_v21 = vpop.f32.mrb[83].mxu0  ;;  %v5104_v18 = vld [vmem:[#allocation10 + $0x5] ss:$0 sm:$0xff] }
 0x521   : > { %v1719_v23 = vadd.f32 %v5054_v29, %v1718_v21  ;;  %3694 = vmatprep.mubr.f32.mxu1 %v1803_v17  ;;  %4120 = vmatpush3.bf16.msra.mxu1 %v4086_v5  ;;  %v5099_v17 = vpack.c.bf16 %v2390_v22, %v2389_v16 }
 0x522   : > { %3695 = vmatmul.mubr.f32.gmra.mrb[80].mxu1 %v1804_v19  ;;  %v1806_v26 = vmax.f32 %v1724_v20, 0.0 }
 0x523   : > { %v1805_v24 = vmax.f32 %v1719_v23, 0.0  ;;  %v3622_v25 = vpop.f32.mrb[84].mxu0 }
 0x524   : > { %v1734_v27 = vadd.f32 %v3622_v25, %v5054_v29  ;;  %v1728_v28 = vpop.f32.mrb[85].mxu0 }
 0x525   : > { %v1729_v30 = vadd.f32 %v5054_v29, %v1728_v28  ;;  %3697 = vmatprep.mubr.f32.mxu1 %v1805_v24 }
 0x526   : > { %3698 = vmatmul.mubr.f32.gmra.mrb[82].mxu1 %v1806_v26  ;;  %v1808_v33 = vmax.f32 %v1734_v27, 0.0 }
 0x527   : > { %v1807_v31 = vmax.f32 %v1729_v30, 0.0  ;;  %v3625_v32 = vpop.f32.mrb[86].mxu0 }
 0x528   : > { %v1744_v34 = vadd.f32 %v3625_v32, %v5054_v29  ;;  %v1738_v35 = vpop.f32.mrb[87].mxu0 }
 0x529   : > { %v1739_v36 = vadd.f32 %v5054_v29, %v1738_v35  ;;  %3700 = vmatprep.mubr.f32.mxu1 %v1807_v31 }
 0x52a   : > { %3701 = vmatmul.mubr.f32.gmra.mrb[84].mxu1 %v1808_v33  ;;  %v1810_v39 = vmax.f32 %v1744_v34, 0.0 }
 0x52b   : > { %v1809_v37 = vmax.f32 %v1739_v36, 0.0  ;;  %v3628_v38 = vpop.f32.mrb[88].mxu0 }
 0x52c   : > { %v1754_v40 = vadd.f32 %v3628_v38, %v5054_v29  ;;  %v1748_v41 = vpop.f32.mrb[89].mxu0 }
 0x52d   : > { %v1749_v42 = vadd.f32 %v5054_v29, %v1748_v41  ;;  %3703 = vmatprep.mubr.f32.mxu1 %v1809_v37 }
 0x52e   : > { %3704 = vmatmul.mubr.f32.gmra.mrb[86].mxu1 %v1810_v39  ;;  %v1812_v45 = vmax.f32 %v1754_v40, 0.0 }
 0x52f   : > { %v1811_v43 = vmax.f32 %v1749_v42, 0.0  ;;  %v3631_v44 = vpop.f32.mrb[90].mxu0 }
 0x530   : > { %v1764_v46 = vadd.f32 %v3631_v44, %v5054_v29  ;;  %v1758_v47 = vpop.f32.mrb[91].mxu0 }
 0x531   : > { %v1759_v48 = vadd.f32 %v5054_v29, %v1758_v47  ;;  %3706 = vmatprep.mubr.f32.mxu1 %v1811_v43 }
 0x532   : > { %3707 = vmatmul.mubr.f32.gmra.mrb[88].mxu1 %v1812_v45  ;;  %v1814_v51 = vmax.f32 %v1764_v46, 0.0 }
 0x533   : > { %v1813_v49 = vmax.f32 %v1759_v48, 0.0  ;;  %v3634_v50 = vpop.f32.mrb[92].mxu0 }
 0x534   : > { %v1774_v52 = vadd.f32 %v3634_v50, %v5054_v29  ;;  %v1768_v53 = vpop.f32.mrb[93].mxu0 }
 0x535   : > { %v1769_v8 = vadd.f32 %v5054_v29, %v1768_v53  ;;  %3709 = vmatprep.mubr.f32.mxu1 %v1813_v49 }
 0x536   : > { %3710 = vmatmul.mubr.f32.gmra.mrb[90].mxu1 %v1814_v51  ;;  %v1816_v56 = vmax.f32 %v1774_v52, 0.0 }
 0x537   : > { %v1815_v54 = vmax.f32 %v1769_v8, 0.0  ;;  %v3637_v55 = vpop.f32.mrb[94].mxu0 }
 0x538   : > { %v1784_v57 = vadd.f32 %v3637_v55, %v5054_v29  ;;  %v1778_v58 = vpop.f32.mrb[95].mxu0 }
 0x539   : > { %v1779_v59 = vadd.f32 %v5054_v29, %v1778_v58  ;;  %3712 = vmatprep.mubr.f32.mxu1 %v1815_v54  ;;  %v2383_v29 = vld [vmem:[#allocation8 + $0x30] sm:$0xff] }
 0x53a   : > { %3713 = vmatmul.mubr.f32.gmra.mrb[92].mxu1 %v1816_v56  ;;  %v1818_v60 = vmax.f32 %v1784_v57, 0.0  ;;  %v5088_v7 = vpack.c.bf16 %v2384_v6, %v2383_v29 }
 0x53b   : > { %v1817_v15 = vmax.f32 %v1779_v59, 0.0 }
 0x53c   : > { %4113 = vmatprep.subr.bf16.mxu1 %v5088_v7 }
 0x53d   : > { %3715 = vmatprep.mubr.f32.mxu1 %v1817_v15  ;;  %4121 = vmatpush3.bf16.msra.mxu1 %v5088_v7 }
 0x53e   : > { %3716 = vmatmul.mubr.f32.gmra.mrb[94].mxu1 %v1818_v60  ;;  %4114 = vmatprep.subr.bf16.mxu1 %v5091_v11 }
 0x541   : > { %4122 = vmatpush3.bf16.msra.mxu1 %v5091_v11 }
 0x542   : > { %4115 = vmatprep.subr.bf16.mxu1 %v5095_v14 }
 0x545   : > { %4123 = vmatpush3.bf16.msra.mxu1 %v5095_v14 }
 0x546   : > { %4116 = vmatprep.subr.bf16.mxu1 %v5099_v17 }
 0x549   : > { %4124 = vmatpush3.bf16.msra.mxu1 %v5099_v17 }
 0x5d5   : > { %v3672_v19 = vpop.f32.mrb[64].mxu1 }
 0x5d6   : > { %v1913_v20 = vadd.f32 %v3672_v19, %v5104_v18  ;;  %v1907_v21 = vpop.f32.mrb[65].mxu1 }
 0x5d7   : > { %v1908_v23 = vadd.f32 %v5104_v18, %v1907_v21 }
 0x5d8   : > { %v2067_v26 = vmax.f32 %v1913_v20, 0.0 }
 0x5d9   : > { %v2066_v24 = vmax.f32 %v1908_v23, 0.0  ;;  %v3675_v25 = vpop.f32.mrb[66].mxu1 }
 0x5da   : > { %v1923_v27 = vadd.f32 %v3675_v25, %v5104_v18  ;;  %v1917_v28 = vpop.f32.mrb[67].mxu1 }
 0x5db   : > { %v1918_v30 = vadd.f32 %v5104_v18, %v1917_v28  ;;  %3750 = vmatprep.mubr.f32.mxu0 %v2066_v24 }
 0x5dc   : > { %3751 = vmatmul.mubr.f32.vlgmr.msra.gmra.mrb[96].mxu0 %v2067_v26  ;;  %v2069_v33 = vmax.f32 %v1923_v27, 0.0 }
 0x5dd   : > { %v2068_v31 = vmax.f32 %v1918_v30, 0.0  ;;  %v3678_v32 = vpop.f32.mrb[68].mxu1  ;;  %4081 = vmatpush3.bf16.msra.mxu0 %v4078_v0 }
 0x5de   : > { %v1933_v34 = vadd.f32 %v3678_v32, %v5104_v18  ;;  %v1927_v35 = vpop.f32.mrb[69].mxu1  ;;  %4083 = vmatprep.subr.bf16.mxu0 %v4082_v2 }
 0x5df   : > { %v1928_v36 = vadd.f32 %v5104_v18, %v1927_v35  ;;  %3753 = vmatprep.mubr.f32.mxu0 %v2068_v31 }
 0x5e0   : > { %3754 = vmatmul.mubr.f32.gmra.mrb[98].mxu0 %v2069_v33  ;;  %v2071_v39 = vmax.f32 %v1933_v34, 0.0 }
 0x5e1   : > { %v2070_v37 = vmax.f32 %v1928_v36, 0.0  ;;  %v3681_v38 = vpop.f32.mrb[70].mxu1  ;;  %4085 = vmatpush3.bf16.msra.mxu0 %v4082_v2 }
 0x5e2   : > { %v1943_v40 = vadd.f32 %v3681_v38, %v5104_v18  ;;  %v1937_v41 = vpop.f32.mrb[71].mxu1  ;;  %4087 = vmatprep.subr.bf16.mxu0 %v4086_v5 }
 0x5e3   : > { %v1938_v42 = vadd.f32 %v5104_v18, %v1937_v41  ;;  %3756 = vmatprep.mubr.f32.mxu0 %v2070_v37 }
 0x5e4   : > { %3757 = vmatmul.mubr.f32.gmra.mrb[100].mxu0 %v2071_v39  ;;  %v2073_v45 = vmax.f32 %v1943_v40, 0.0 }
 0x5e5   : > { %v2072_v43 = vmax.f32 %v1938_v42, 0.0  ;;  %v3684_v44 = vpop.f32.mrb[72].mxu1  ;;  %4089 = vmatpush3.bf16.msra.mxu0 %v4086_v5 }
 0x5e6   : > { %v1953_v46 = vadd.f32 %v3684_v44, %v5104_v18  ;;  %v1947_v47 = vpop.f32.mrb[73].mxu1  ;;  %4091 = vmatprep.subr.bf16.mxu0 %v5088_v7 }
 0x5e7   : > { %v1948_v48 = vadd.f32 %v5104_v18, %v1947_v47  ;;  %3759 = vmatprep.mubr.f32.mxu0 %v2072_v43 }
 0x5e8   : > { %3760 = vmatmul.mubr.f32.gmra.mrb[102].mxu0 %v2073_v45  ;;  %v2075_v51 = vmax.f32 %v1953_v46, 0.0 }
 0x5e9   : > { %v2074_v49 = vmax.f32 %v1948_v48, 0.0  ;;  %v3687_v50 = vpop.f32.mrb[74].mxu1  ;;  %4093 = vmatpush3.bf16.msra.mxu0 %v5088_v7 }
 0x5ea   : > { %v1963_v52 = vadd.f32 %v3687_v50, %v5104_v18  ;;  %v1957_v53 = vpop.f32.mrb[75].mxu1  ;;  %4095 = vmatprep.subr.bf16.mxu0 %v5091_v11 }
 0x5eb   : > { %v1958_v8 = vadd.f32 %v5104_v18, %v1957_v53  ;;  %3762 = vmatprep.mubr.f32.mxu0 %v2074_v49 }
 0x5ec   : > { %3763 = vmatmul.mubr.f32.gmra.mrb[104].mxu0 %v2075_v51  ;;  %v2077_v56 = vmax.f32 %v1963_v52, 0.0 }
 0x5ed   : > { %v2076_v54 = vmax.f32 %v1958_v8, 0.0  ;;  %v3690_v55 = vpop.f32.mrb[76].mxu1  ;;  %4097 = vmatpush3.bf16.msra.mxu0 %v5091_v11  ;;  %v2391_v8 = vld [vmem:[#allocation8 + $0x70] sm:$0xff] }
 0x5ee   : > { %v1973_v57 = vadd.f32 %v3690_v55, %v5104_v18  ;;  %v1967_v58 = vpop.f32.mrb[77].mxu1  ;;  %4099 = vmatprep.subr.bf16.mxu0 %v5095_v14 }
 0x5ef   : > { %v1968_v59 = vadd.f32 %v5104_v18, %v1967_v58  ;;  %3765 = vmatprep.mubr.f32.mxu0 %v2076_v54  ;;  %v2392_v54 = vld [vmem:[#allocation8 + $0x78] sm:$0xff] }
 0x5f0   : > { %3766 = vmatmul.mubr.f32.gmra.mrb[106].mxu0 %v2077_v56  ;;  %v2079_v61 = vmax.f32 %v1973_v57, 0.0  ;;  %v4106_v55 = vpack.c.bf16 %v2392_v54, %v2391_v8  ;;  %v5146_v56 = vld [vmem:[#allocation10 + $0x6] ss:$0 sm:$0xff] }
 0x5f1   : > { %v2078_v15 = vmax.f32 %v1968_v59, 0.0  ;;  %v3693_v60 = vpop.f32.mrb[78].mxu1  ;;  %4101 = vmatpush3.bf16.msra.mxu0 %v5095_v14 }
 0x5f2   : > { %v1983_v62 = vadd.f32 %v3693_v60, %v5104_v18  ;;  %v1977_v63 = vpop.f32.mrb[79].mxu1  ;;  %4103 = vmatprep.subr.bf16.mxu0 %v5099_v17  ;;  %4117 = vmatprep.subr.bf16.mxu1 %v4106_v55 }
 0x5f3   : > { %v1978_v0 = vadd.f32 %v5104_v18, %v1977_v63  ;;  %3768 = vmatprep.mubr.f32.mxu0 %v2078_v15  ;;  %4125 = vmatpush3.bf16.msra.mxu1 %v4106_v55 }
 0x5f4   : > { %3769 = vmatmul.mubr.f32.gmra.mrb[108].mxu0 %v2079_v61  ;;  %v2081_v3 = vmax.f32 %v1983_v62, 0.0 }
 0x5f5   : > { %v2080_v1 = vmax.f32 %v1978_v0, 0.0  ;;  %v3696_v2 = vpop.f32.mrb[80].mxu1  ;;  %4105 = vmatpush3.bf16.msra.mxu0 %v5099_v17 }
 0x5f6   : > { %v1993_v4 = vadd.f32 %v3696_v2, %v5104_v18  ;;  %v1987_v5 = vpop.f32.mrb[81].mxu1  ;;  %4107 = vmatprep.subr.bf16.mxu0 %v4106_v55 }
 0x5f7   : > { %v1988_v29 = vadd.f32 %v5104_v18, %v1987_v5  ;;  %3771 = vmatprep.mubr.f32.mxu0 %v2080_v1 }
 0x5f8   : > { %3772 = vmatmul.mubr.f32.gmra.mrb[110].mxu0 %v2081_v3  ;;  %v2083_v9 = vmax.f32 %v1993_v4, 0.0 }
 0x5f9   : > { %v2082_v6 = vmax.f32 %v1988_v29, 0.0  ;;  %v3699_v7 = vpop.f32.mrb[82].mxu1  ;;  %4109 = vmatpush3.bf16.msra.mxu0 %v4106_v55 }
 0x5fa   : > { %v2003_v10 = vadd.f32 %v3699_v7, %v5104_v18  ;;  %v1997_v11 = vpop.f32.mrb[83].mxu1 }
 0x5fb   : > { %v1998_v12 = vadd.f32 %v5104_v18, %v1997_v11  ;;  %3774 = vmatprep.mubr.f32.mxu0 %v2082_v6 }
 0x5fc   : > { %3775 = vmatmul.mubr.f32.gmra.mrb[112].mxu0 %v2083_v9  ;;  %v2085_v16 = vmax.f32 %v2003_v10, 0.0 }
 0x5fd   : > { %v2084_v13 = vmax.f32 %v1998_v12, 0.0  ;;  %v3702_v14 = vpop.f32.mrb[84].mxu1 }
 0x5fe   : > { %v2013_v22 = vadd.f32 %v3702_v14, %v5104_v18  ;;  %v2007_v17 = vpop.f32.mrb[85].mxu1 }
 0x5ff   : > { %v2008_v19 = vadd.f32 %v5104_v18, %v2007_v17  ;;  %3777 = vmatprep.mubr.f32.mxu0 %v2084_v13 }
 0x600   : > { %3778 = vmatmul.mubr.f32.gmra.mrb[114].mxu0 %v2085_v16  ;;  %v2087_v23 = vmax.f32 %v2013_v22, 0.0 }
 0x601   : > { %v2086_v20 = vmax.f32 %v2008_v19, 0.0  ;;  %v3705_v21 = vpop.f32.mrb[86].mxu1 }
 0x602   : > { %v2023_v24 = vadd.f32 %v3705_v21, %v5104_v18  ;;  %v2017_v25 = vpop.f32.mrb[87].mxu1 }
 0x603   : > { %v2018_v26 = vadd.f32 %v5104_v18, %v2017_v25  ;;  %3780 = vmatprep.mubr.f32.mxu0 %v2086_v20 }
 0x604   : > { %3781 = vmatmul.mubr.f32.gmra.mrb[116].mxu0 %v2087_v23  ;;  %v2089_v30 = vmax.f32 %v2023_v24, 0.0 }
 0x605   : > { %v2088_v27 = vmax.f32 %v2018_v26, 0.0  ;;  %v3708_v28 = vpop.f32.mrb[88].mxu1 }
 0x606   : > { %v2033_v31 = vadd.f32 %v3708_v28, %v5104_v18  ;;  %v2027_v32 = vpop.f32.mrb[89].mxu1 }
 0x607   : > { %v2028_v33 = vadd.f32 %v5104_v18, %v2027_v32  ;;  %3783 = vmatprep.mubr.f32.mxu0 %v2088_v27 }
 0x608   : > { %3784 = vmatmul.mubr.f32.gmra.mrb[118].mxu0 %v2089_v30  ;;  %v2091_v36 = vmax.f32 %v2033_v31, 0.0 }
 0x609   : > { %v2090_v34 = vmax.f32 %v2028_v33, 0.0  ;;  %v3711_v35 = vpop.f32.mrb[90].mxu1 }
 0x60a   : > { %v2043_v37 = vadd.f32 %v3711_v35, %v5104_v18  ;;  %v2037_v38 = vpop.f32.mrb[91].mxu1 }
 0x60b   : > { %v2038_v39 = vadd.f32 %v5104_v18, %v2037_v38  ;;  %3786 = vmatprep.mubr.f32.mxu0 %v2090_v34 }
 0x60c   : > { %3787 = vmatmul.mubr.f32.gmra.mrb[120].mxu0 %v2091_v36  ;;  %v2093_v42 = vmax.f32 %v2043_v37, 0.0 }
 0x60d   : > { %v2092_v40 = vmax.f32 %v2038_v39, 0.0  ;;  %v3714_v41 = vpop.f32.mrb[92].mxu1 }
 0x60e   : > { %v2053_v43 = vadd.f32 %v3714_v41, %v5104_v18  ;;  %v2047_v44 = vpop.f32.mrb[93].mxu1 }
 0x60f   : > { %v2048_v45 = vadd.f32 %v5104_v18, %v2047_v44  ;;  %3789 = vmatprep.mubr.f32.mxu0 %v2092_v40 }
 0x610   : > { %3790 = vmatmul.mubr.f32.gmra.mrb[122].mxu0 %v2093_v42  ;;  %v2095_v48 = vmax.f32 %v2053_v43, 0.0 }
 0x611   : > { %v2094_v46 = vmax.f32 %v2048_v45, 0.0  ;;  %v3717_v47 = vpop.f32.mrb[94].mxu1 }
 0x612   : > { %v2063_v49 = vadd.f32 %v3717_v47, %v5104_v18  ;;  %v2057_v50 = vpop.f32.mrb[95].mxu1 }
 0x613   : > { %v2058_v51 = vadd.f32 %v5104_v18, %v2057_v50  ;;  %3792 = vmatprep.mubr.f32.mxu0 %v2094_v46 }
 0x614   : > { %3793 = vmatmul.mubr.f32.gmra.mrb[124].mxu0 %v2095_v48  ;;  %v2097_v53 = vmax.f32 %v2063_v49, 0.0 }
 0x615   : > { %v2096_v52 = vmax.f32 %v2058_v51, 0.0 }
 0x617   : > { %3795 = vmatprep.mubr.f32.mxu0 %v2096_v52 }
 0x618   : > { %3796 = vmatmul.mubr.f32.gmra.mrb[126].mxu0 %v2097_v53 }
 0x6af   : > { %v3752_v57 = vpop.f32.mrb[96].mxu0 }
 0x6b0   : > { %v2192_v58 = vadd.f32 %v3752_v57, %v5146_v56  ;;  %v2186_v59 = vpop.f32.mrb[97].mxu0 }
 0x6b1   : > { %v2187_v18 = vadd.f32 %v5146_v56, %v2186_v59 }
 0x6b2   : > { %v2346_v61 = vmax.f32 %v2192_v58, 0.0 }
 0x6b3   : > { %v2345_v15 = vmax.f32 %v2187_v18, 0.0  ;;  %v3755_v60 = vpop.f32.mrb[98].mxu0 }
 0x6b4   : > { %v2202_v62 = vadd.f32 %v3755_v60, %v5146_v56  ;;  %v2196_v63 = vpop.f32.mrb[99].mxu0 }
 0x6b5   : > { %v2197_v0 = vadd.f32 %v5146_v56, %v2196_v63  ;;  %3830 = vmatprep.mubr.f32.mxu0 %v2345_v15 }
 0x6b6   : > { %3831 = vmatmul.mubr.f32.vlgmr.msra.gmra.mrb[128].mxu0 %v2346_v61  ;;  %v2348_v3 = vmax.f32 %v2202_v62, 0.0 }
 0x6b7   : > { %v2347_v1 = vmax.f32 %v2197_v0, 0.0  ;;  %v3758_v2 = vpop.f32.mrb[100].mxu0 }
 0x6b8   : > { %v2212_v4 = vadd.f32 %v3758_v2, %v5146_v56  ;;  %v2206_v5 = vpop.f32.mrb[101].mxu0 }
 0x6b9   : > { %v2207_v29 = vadd.f32 %v5146_v56, %v2206_v5  ;;  %3833 = vmatprep.mubr.f32.mxu0 %v2347_v1 }
 0x6ba   : > { %3834 = vmatmul.mubr.f32.gmra.mrb[130].mxu0 %v2348_v3  ;;  %v2350_v9 = vmax.f32 %v2212_v4, 0.0 }
 0x6bb   : > { %v2349_v6 = vmax.f32 %v2207_v29, 0.0  ;;  %v3761_v7 = vpop.f32.mrb[102].mxu0 }
 0x6bc   : > { %v2222_v10 = vadd.f32 %v3761_v7, %v5146_v56  ;;  %v2216_v11 = vpop.f32.mrb[103].mxu0 }
 0x6bd   : > { %v2217_v12 = vadd.f32 %v5146_v56, %v2216_v11  ;;  %3836 = vmatprep.mubr.f32.mxu0 %v2349_v6 }
 0x6be   : > { %3837 = vmatmul.mubr.f32.gmra.mrb[132].mxu0 %v2350_v9  ;;  %v2352_v16 = vmax.f32 %v2222_v10, 0.0 }
 0x6bf   : > { %v2351_v13 = vmax.f32 %v2217_v12, 0.0  ;;  %v3764_v14 = vpop.f32.mrb[104].mxu0 }
 0x6c0   : > { %v2232_v22 = vadd.f32 %v3764_v14, %v5146_v56  ;;  %v2226_v17 = vpop.f32.mrb[105].mxu0 }
 0x6c1   : > { %v2227_v19 = vadd.f32 %v5146_v56, %v2226_v17  ;;  %3839 = vmatprep.mubr.f32.mxu1 %v2351_v13 }
 0x6c2   : > { %3840 = vmatmul.mubr.f32.vlgmr.msra.gmra.mrb[96].mxu1 %v2352_v16  ;;  %v2354_v23 = vmax.f32 %v2232_v22, 0.0 }
 0x6c3   : > { %v2353_v20 = vmax.f32 %v2227_v19, 0.0  ;;  %v3767_v21 = vpop.f32.mrb[106].mxu0 }
 0x6c4   : > { %v2242_v24 = vadd.f32 %v3767_v21, %v5146_v56  ;;  %v2236_v25 = vpop.f32.mrb[107].mxu0 }
 0x6c5   : > { %v2237_v26 = vadd.f32 %v5146_v56, %v2236_v25  ;;  %3842 = vmatprep.mubr.f32.mxu1 %v2353_v20 }
 0x6c6   : > { %3843 = vmatmul.mubr.f32.gmra.mrb[98].mxu1 %v2354_v23  ;;  %v2356_v30 = vmax.f32 %v2242_v24, 0.0 }
 0x6c7   : > { %v2355_v27 = vmax.f32 %v2237_v26, 0.0  ;;  %v3770_v28 = vpop.f32.mrb[108].mxu0  ;;  %v5180_v26 = vld [vmem:[#allocation11] ss:$0 sm:$0xff] }
 0x6c8   : > { %v2252_v31 = vadd.f32 %v3770_v28, %v5146_v56  ;;  %v2246_v32 = vpop.f32.mrb[109].mxu0 }
 0x6c9   : > { %v2247_v33 = vadd.f32 %v5146_v56, %v2246_v32  ;;  %3845 = vmatprep.mubr.f32.mxu1 %v2355_v27 }
 0x6ca   : > { %3846 = vmatmul.mubr.f32.gmra.mrb[100].mxu1 %v2356_v30  ;;  %v2358_v36 = vmax.f32 %v2252_v31, 0.0 }
 0x6cb   : > { %v2357_v34 = vmax.f32 %v2247_v33, 0.0  ;;  %v3773_v35 = vpop.f32.mrb[110].mxu0 }
 0x6cc   : > { %v2262_v37 = vadd.f32 %v3773_v35, %v5146_v56  ;;  %v2256_v38 = vpop.f32.mrb[111].mxu0 }
 0x6cd   : > { %v2257_v39 = vadd.f32 %v5146_v56, %v2256_v38  ;;  %3848 = vmatprep.mubr.f32.mxu1 %v2357_v34 }
 0x6ce   : > { %3849 = vmatmul.mubr.f32.gmra.mrb[102].mxu1 %v2358_v36  ;;  %v2360_v42 = vmax.f32 %v2262_v37, 0.0 }
 0x6cf   : > { %v2359_v40 = vmax.f32 %v2257_v39, 0.0  ;;  %v3776_v41 = vpop.f32.mrb[112].mxu0 }
 0x6d0   : > { %v2272_v43 = vadd.f32 %v3776_v41, %v5146_v56  ;;  %v2266_v44 = vpop.f32.mrb[113].mxu0 }
 0x6d1   : > { %v2267_v45 = vadd.f32 %v5146_v56, %v2266_v44  ;;  %3851 = vmatprep.mubr.f32.mxu1 %v2359_v40 }
 0x6d2   : > { %3852 = vmatmul.mubr.f32.gmra.mrb[104].mxu1 %v2360_v42  ;;  %v2362_v48 = vmax.f32 %v2272_v43, 0.0 }
 0x6d3   : > { %v2361_v46 = vmax.f32 %v2267_v45, 0.0  ;;  %v3779_v47 = vpop.f32.mrb[114].mxu0 }
 0x6d4   : > { %v2282_v49 = vadd.f32 %v3779_v47, %v5146_v56  ;;  %v2276_v50 = vpop.f32.mrb[115].mxu0 }
 0x6d5   : > { %v2277_v51 = vadd.f32 %v5146_v56, %v2276_v50  ;;  %3854 = vmatprep.mubr.f32.mxu1 %v2361_v46 }
 0x6d6   : > { %3855 = vmatmul.mubr.f32.gmra.mrb[106].mxu1 %v2362_v48  ;;  %v2364_v8 = vmax.f32 %v2282_v49, 0.0 }
 0x6d7   : > { %v2363_v52 = vmax.f32 %v2277_v51, 0.0  ;;  %v3782_v53 = vpop.f32.mrb[116].mxu0 }
 0x6d8   : > { %v2292_v54 = vadd.f32 %v3782_v53, %v5146_v56  ;;  %v2286_v55 = vpop.f32.mrb[117].mxu0 }
 0x6d9   : > { %v2287_v57 = vadd.f32 %v5146_v56, %v2286_v55  ;;  %3857 = vmatprep.mubr.f32.mxu1 %v2363_v52 }
 0x6da   : > { %3858 = vmatmul.mubr.f32.gmra.mrb[108].mxu1 %v2364_v8  ;;  %v2366_v18 = vmax.f32 %v2292_v54, 0.0 }
 0x6db   : > { %v2365_v58 = vmax.f32 %v2287_v57, 0.0  ;;  %v3785_v59 = vpop.f32.mrb[118].mxu0 }
 0x6dc   : > { %v2302_v15 = vadd.f32 %v3785_v59, %v5146_v56  ;;  %v2296_v60 = vpop.f32.mrb[119].mxu0 }
 0x6dd   : > { %v2297_v61 = vadd.f32 %v5146_v56, %v2296_v60  ;;  %3860 = vmatprep.mubr.f32.mxu1 %v2365_v58 }
 0x6de   : > { %3861 = vmatmul.mubr.f32.gmra.mrb[110].mxu1 %v2366_v18  ;;  %v2368_v0 = vmax.f32 %v2302_v15, 0.0 }
 0x6df   : > { %v2367_v62 = vmax.f32 %v2297_v61, 0.0  ;;  %v3788_v63 = vpop.f32.mrb[120].mxu0 }
 0x6e0   : > { %v2312_v1 = vadd.f32 %v3788_v63, %v5146_v56  ;;  %v2306_v2 = vpop.f32.mrb[121].mxu0 }
 0x6e1   : > { %v2307_v3 = vadd.f32 %v5146_v56, %v2306_v2  ;;  %3863 = vmatprep.mubr.f32.mxu1 %v2367_v62 }
 0x6e2   : > { %3864 = vmatmul.mubr.f32.gmra.mrb[112].mxu1 %v2368_v0  ;;  %v2370_v29 = vmax.f32 %v2312_v1, 0.0 }
 0x6e3   : > { %v2369_v4 = vmax.f32 %v2307_v3, 0.0  ;;  %v3791_v5 = vpop.f32.mrb[122].mxu0 }
 0x6e4   : > { %v2322_v6 = vadd.f32 %v3791_v5, %v5146_v56  ;;  %v2316_v7 = vpop.f32.mrb[123].mxu0 }
 0x6e5   : > { %v2317_v9 = vadd.f32 %v5146_v56, %v2316_v7  ;;  %3866 = vmatprep.mubr.f32.mxu1 %v2369_v4 }
 0x6e6   : > { %3867 = vmatmul.mubr.f32.gmra.mrb[114].mxu1 %v2370_v29  ;;  %v2372_v12 = vmax.f32 %v2322_v6, 0.0 }
 0x6e7   : > { %v2371_v10 = vmax.f32 %v2317_v9, 0.0  ;;  %v3794_v11 = vpop.f32.mrb[124].mxu0 }
 0x6e8   : > { %v2332_v13 = vadd.f32 %v3794_v11, %v5146_v56  ;;  %v2326_v14 = vpop.f32.mrb[125].mxu0 }
 0x6e9   : > { %v2327_v16 = vadd.f32 %v5146_v56, %v2326_v14  ;;  %3869 = vmatprep.mubr.f32.mxu1 %v2371_v10 }
 0x6ea   : > { %3870 = vmatmul.mubr.f32.gmra.mrb[116].mxu1 %v2372_v12  ;;  %v2374_v19 = vmax.f32 %v2332_v13, 0.0 }
 0x6eb   : > { %v2373_v22 = vmax.f32 %v2327_v16, 0.0  ;;  %v3797_v17 = vpop.f32.mrb[126].mxu0 }
 0x6ec   : > { %v2342_v20 = vadd.f32 %v3797_v17, %v5146_v56  ;;  %v2336_v21 = vpop.f32.mrb[127].mxu0 }
 0x6ed   : > { %v2337_v23 = vadd.f32 %v5146_v56, %v2336_v21  ;;  %3872 = vmatprep.mubr.f32.mxu1 %v2373_v22 }
 0x6ee   : > { %3873 = vmatmul.mubr.f32.gmra.mrb[118].mxu1 %v2374_v19  ;;  %v2376_v25 = vmax.f32 %v2342_v20, 0.0 }
 0x6ef   : > { %v2375_v24 = vmax.f32 %v2337_v23, 0.0 }
 0x6f1   : > { %3875 = vmatprep.mubr.f32.mxu1 %v2375_v24 }
 0x6f2   : > { %3876 = vmatmul.mubr.f32.gmra.mrb[120].mxu1 %v2376_v25 }
 0x789   : > { %v3832_v27 = vpop.f32.mrb[128].mxu0 }
 0x78a   : > { %v2472_v28 = vadd.f32 %v3832_v27, %v5180_v26  ;;  %v2466_v30 = vpop.f32.mrb[129].mxu0 }
 0x78b   : > { %v2467_v31 = vadd.f32 %v5180_v26, %v2466_v30 }
 0x78c   : > { %4227 = vtanh.f32 %v2472_v28 }
 0x78d   : > { %4229 = vtanh.f32 %v2467_v31  ;;  %v3835_v32 = vpop.f32.mrb[130].mxu0 }
 0x78e   : > { %v2482_v33 = vadd.f32 %v3835_v32, %v5180_v26  ;;  %v2476_v56 = vpop.f32.mrb[131].mxu0 }
 0x78f   : > { %v2477_v34 = vadd.f32 %v5180_v26, %v2476_v56 }
 0x790   : > { %4231 = vtanh.f32 %v2482_v33 }
 0x791   : > { %4233 = vtanh.f32 %v2477_v34  ;;  %v3838_v35 = vpop.f32.mrb[132].mxu0 }
 0x792   : > { %v2492_v36 = vadd.f32 %v3838_v35, %v5180_v26  ;;  %v2486_v37 = vpop.f32.mrb[133].mxu0 }
 0x793   : > { %v2487_v38 = vadd.f32 %v5180_v26, %v2486_v37 }
 0x794   : > { %4235 = vtanh.f32 %v2492_v36 }
 0x795   : > { %4237 = vtanh.f32 %v2487_v38  ;;  %v3841_v39 = vpop.f32.mrb[96].mxu1 }
 0x796   : > { %v4228_v40 = vpop.eup %4227  ;;  %v2502_v41 = vadd.f32 %v3841_v39, %v5180_v26  ;;  %v2496_v42 = vpop.f32.mrb[97].mxu1 }
 0x797   : > { %v4230_v43 = vpop.eup %4229  ;;  %2658 = vst.msk [vmem:[%s5191_s28 + $0x8] sm:$0xff] %vm382_vm0, %v4228_v40  ;;  %v2497_v44 = vadd.f32 %v5180_v26, %v2496_v42 }
 0x798   : > { %2657 = vst.msk [vmem:[%s5191_s28] sm:$0xff] %vm382_vm0, %v4230_v43  ;;  %4239 = vtanh.f32 %v2502_v41 }
 0x799   : > { %4241 = vtanh.f32 %v2497_v44  ;;  %v3844_v45 = vpop.f32.mrb[98].mxu1 }
 0x79a   : > { %v4232_v46 = vpop.eup %4231  ;;  %v2512_v47 = vadd.f32 %v3844_v45, %v5180_v26  ;;  %v2506_v48 = vpop.f32.mrb[99].mxu1 }
 0x79b   : > { %v4234_v49 = vpop.eup %4233  ;;  %2660 = vst.msk [vmem:[%s5191_s28 + $0x18] sm:$0xff] %vm382_vm0, %v4232_v46  ;;  %v2507_v50 = vadd.f32 %v5180_v26, %v2506_v48 }
 0x79c   : > { %2659 = vst.msk [vmem:[%s5191_s28 + $0x10] sm:$0xff] %vm382_vm0, %v4234_v49  ;;  %4243 = vtanh.f32 %v2512_v47 }
 0x79d   : > { %4245 = vtanh.f32 %v2507_v50  ;;  %v3847_v51 = vpop.f32.mrb[100].mxu1 }
 0x79e   : > { %v4236_v52 = vpop.eup %4235  ;;  %v2522_v53 = vadd.f32 %v3847_v51, %v5180_v26  ;;  %v2516_v8 = vpop.f32.mrb[101].mxu1 }
 0x79f   : > { %v4238_v54 = vpop.eup %4237  ;;  %2662 = vst.msk [vmem:[%s5191_s28 + $0x28] sm:$0xff] %vm382_vm0, %v4236_v52  ;;  %v2517_v55 = vadd.f32 %v5180_v26, %v2516_v8 }
 0x7a0   : > { %2661 = vst.msk [vmem:[%s5191_s28 + $0x20] sm:$0xff] %vm382_vm0, %v4238_v54  ;;  %4247 = vtanh.f32 %v2522_v53 }
 0x7a1   : > { %4249 = vtanh.f32 %v2517_v55  ;;  %v3850_v57 = vpop.f32.mrb[102].mxu1 }
 0x7a2   : > { %v4240_v58 = vpop.eup %4239  ;;  %v2532_v59 = vadd.f32 %v3850_v57, %v5180_v26  ;;  %v2526_v18 = vpop.f32.mrb[103].mxu1 }
 0x7a3   : > { %v4242_v15 = vpop.eup %4241  ;;  %2664 = vst.msk [vmem:[%s5191_s28 + $0x38] sm:$0xff] %vm382_vm0, %v4240_v58  ;;  %v2527_v60 = vadd.f32 %v5180_v26, %v2526_v18 }
 0x7a4   : > { %2663 = vst.msk [vmem:[%s5191_s28 + $0x30] sm:$0xff] %vm382_vm0, %v4242_v15  ;;  %4251 = vtanh.f32 %v2532_v59 }
 0x7a5   : > { %4253 = vtanh.f32 %v2527_v60  ;;  %v3853_v61 = vpop.f32.mrb[104].mxu1 }
 0x7a6   : > { %v4244_v62 = vpop.eup %4243  ;;  %v2542_v63 = vadd.f32 %v3853_v61, %v5180_v26  ;;  %v2536_v0 = vpop.f32.mrb[105].mxu1 }
 0x7a7   : > { %v4246_v1 = vpop.eup %4245  ;;  %2666 = vst.msk [vmem:[%s5191_s28 + $0x48] sm:$0xff] %vm382_vm0, %v4244_v62  ;;  %v2537_v2 = vadd.f32 %v5180_v26, %v2536_v0 }
 0x7a8   : > { %2665 = vst.msk [vmem:[%s5191_s28 + $0x40] sm:$0xff] %vm382_vm0, %v4246_v1  ;;  %4255 = vtanh.f32 %v2542_v63 }
 0x7a9   : > { %4257 = vtanh.f32 %v2537_v2  ;;  %v3856_v3 = vpop.f32.mrb[106].mxu1 }
 0x7aa   : > { %v4248_v4 = vpop.eup %4247  ;;  %v2552_v5 = vadd.f32 %v3856_v3, %v5180_v26  ;;  %v2546_v29 = vpop.f32.mrb[107].mxu1 }
 0x7ab   : > { %v4250_v6 = vpop.eup %4249  ;;  %2668 = vst.msk [vmem:[%s5191_s28 + $0x58] sm:$0xff] %vm382_vm0, %v4248_v4  ;;  %v2547_v7 = vadd.f32 %v5180_v26, %v2546_v29 }
 0x7ac   : > { %2667 = vst.msk [vmem:[%s5191_s28 + $0x50] sm:$0xff] %vm382_vm0, %v4250_v6  ;;  %4259 = vtanh.f32 %v2552_v5 }
 0x7ad   : > { %4261 = vtanh.f32 %v2547_v7  ;;  %v3859_v9 = vpop.f32.mrb[108].mxu1 }
 0x7ae   : > { %v4252_v10 = vpop.eup %4251  ;;  %v2562_v11 = vadd.f32 %v3859_v9, %v5180_v26  ;;  %v2556_v12 = vpop.f32.mrb[109].mxu1 }
 0x7af   : > { %v4254_v13 = vpop.eup %4253  ;;  %2670 = vst.msk [vmem:[%s5191_s28 + $0x68] sm:$0xff] %vm382_vm0, %v4252_v10  ;;  %v2557_v14 = vadd.f32 %v5180_v26, %v2556_v12 }
 0x7b0   : > { %2669 = vst.msk [vmem:[%s5191_s28 + $0x60] sm:$0xff] %vm382_vm0, %v4254_v13  ;;  %4263 = vtanh.f32 %v2562_v11 }
 0x7b1   : > { %4265 = vtanh.f32 %v2557_v14  ;;  %v3862_v16 = vpop.f32.mrb[110].mxu1 }
 0x7b2   : > { %v4256_v22 = vpop.eup %4255  ;;  %v2572_v17 = vadd.f32 %v3862_v16, %v5180_v26  ;;  %v2566_v19 = vpop.f32.mrb[111].mxu1 }
 0x7b3   : > { %v4258_v20 = vpop.eup %4257  ;;  %2672 = vst.msk [vmem:[%s5191_s28 + $0x78] sm:$0xff] %vm382_vm0, %v4256_v22  ;;  %v2567_v21 = vadd.f32 %v5180_v26, %v2566_v19 }
 0x7b4   : > { %2671 = vst.msk [vmem:[%s5191_s28 + $0x70] sm:$0xff] %vm382_vm0, %v4258_v20  ;;  %4267 = vtanh.f32 %v2572_v17 }
 0x7b5   : > { %4269 = vtanh.f32 %v2567_v21  ;;  %v3865_v23 = vpop.f32.mrb[112].mxu1 }
 0x7b6   : > { %v4260_v24 = vpop.eup %4259  ;;  %v2582_v25 = vadd.f32 %v3865_v23, %v5180_v26  ;;  %v2576_v27 = vpop.f32.mrb[113].mxu1 }
 0x7b7   : > { %v4262_v28 = vpop.eup %4261  ;;  %2674 = vst.msk [vmem:[%s5191_s28 + $0x88] sm:$0xff] %vm382_vm0, %v4260_v24  ;;  %v2577_v30 = vadd.f32 %v5180_v26, %v2576_v27 }
 0x7b8   : > { %2673 = vst.msk [vmem:[%s5191_s28 + $0x80] sm:$0xff] %vm382_vm0, %v4262_v28  ;;  %4271 = vtanh.f32 %v2582_v25 }
 0x7b9   : > { %4273 = vtanh.f32 %v2577_v30  ;;  %v3868_v31 = vpop.f32.mrb[114].mxu1 }
 0x7ba   : > { %v4264_v32 = vpop.eup %4263  ;;  %v2592_v33 = vadd.f32 %v3868_v31, %v5180_v26  ;;  %v2586_v56 = vpop.f32.mrb[115].mxu1 }
 0x7bb   : > { %v4266_v34 = vpop.eup %4265  ;;  %2676 = vst.msk [vmem:[%s5191_s28 + $0x98] sm:$0xff] %vm382_vm0, %v4264_v32  ;;  %v2587_v35 = vadd.f32 %v5180_v26, %v2586_v56 }
 0x7bc   : > { %2675 = vst.msk [vmem:[%s5191_s28 + $0x90] sm:$0xff] %vm382_vm0, %v4266_v34  ;;  %4275 = vtanh.f32 %v2592_v33 }
 0x7bd   : > { %4277 = vtanh.f32 %v2587_v35  ;;  %v3871_v36 = vpop.f32.mrb[116].mxu1 }
 0x7be   : > { %v4268_v37 = vpop.eup %4267  ;;  %v2602_v38 = vadd.f32 %v3871_v36, %v5180_v26  ;;  %v2596_v39 = vpop.f32.mrb[117].mxu1 }
 0x7bf   : > { %v4270_v40 = vpop.eup %4269  ;;  %2678 = vst.msk [vmem:[%s5191_s28 + $0xa8] sm:$0xff] %vm382_vm0, %v4268_v37  ;;  %v2597_v41 = vadd.f32 %v5180_v26, %v2596_v39 }
 0x7c0   : > { %2677 = vst.msk [vmem:[%s5191_s28 + $0xa0] sm:$0xff] %vm382_vm0, %v4270_v40  ;;  %4279 = vtanh.f32 %v2602_v38 }
 0x7c1   : > { %4281 = vtanh.f32 %v2597_v41  ;;  %v3874_v42 = vpop.f32.mrb[118].mxu1 }
 0x7c2   : > { %v4272_v43 = vpop.eup %4271  ;;  %v2612_v44 = vadd.f32 %v3874_v42, %v5180_v26  ;;  %v2606_v45 = vpop.f32.mrb[119].mxu1 }
 0x7c3   : > { %v4274_v46 = vpop.eup %4273  ;;  %2680 = vst.msk [vmem:[%s5191_s28 + $0xb8] sm:$0xff] %vm382_vm0, %v4272_v43  ;;  %v2607_v47 = vadd.f32 %v5180_v26, %v2606_v45 }
 0x7c4   : > { %2679 = vst.msk [vmem:[%s5191_s28 + $0xb0] sm:$0xff] %vm382_vm0, %v4274_v46  ;;  %4283 = vtanh.f32 %v2612_v44 }
 0x7c5   : > { %4285 = vtanh.f32 %v2607_v47  ;;  %v3877_v48 = vpop.f32.mrb[120].mxu1 }
 0x7c6   : > { %v4276_v49 = vpop.eup %4275  ;;  %v2622_v50 = vadd.f32 %v3877_v48, %v5180_v26  ;;  %v2616_v51 = vpop.f32.mrb[121].mxu1 }
 0x7c7   : > { %v4278_v52 = vpop.eup %4277  ;;  %2682 = vst.msk [vmem:[%s5191_s28 + $0xc8] sm:$0xff] %vm382_vm0, %v4276_v49  ;;  %v2617_v53 = vadd.f32 %v5180_v26, %v2616_v51 }
 0x7c8   : > { %2681 = vst.msk [vmem:[%s5191_s28 + $0xc0] sm:$0xff] %vm382_vm0, %v4278_v52  ;;  %4287 = vtanh.f32 %v2622_v50 }
 0x7c9   : > { %4289 = vtanh.f32 %v2617_v53 }
 0x7ca   : > { %v4280_v8 = vpop.eup %4279 }
 0x7cb   : > { %v4282_v54 = vpop.eup %4281  ;;  %2684 = vst.msk [vmem:[%s5191_s28 + $0xd8] sm:$0xff] %vm382_vm0, %v4280_v8 }
 0x7cc   : > { %2683 = vst.msk [vmem:[%s5191_s28 + $0xd0] sm:$0xff] %vm382_vm0, %v4282_v54 }
 0x7ce   : > { %v4284_v55 = vpop.eup %4283 }
 0x7cf   : > { %v4286_v57 = vpop.eup %4285  ;;  %2686 = vst.msk [vmem:[%s5191_s28 + $0xe8] sm:$0xff] %vm382_vm0, %v4284_v55 }
 0x7d0   : > { %2685 = vst.msk [vmem:[%s5191_s28 + $0xe0] sm:$0xff] %vm382_vm0, %v4286_v57 }
 0x7d2   : > { %v4288_v26 = vpop.eup %4287 }
 0x7d3   : > { %v4290_v58 = vpop.eup %4289  ;;  %2688 = vst.msk [vmem:[%s5191_s28 + $0xf8] sm:$0xff] %vm382_vm0, %v4288_v26 }
 0x7d4   : > { %2687 = vst.msk [vmem:[%s5191_s28 + $0xf0] sm:$0xff] %vm382_vm0, %v4290_v58 }
 0x7d5   : > { %4474 = shalt.err (!%p4471_p8)
}
 0x7d6   : > { %s4475_s13 = scalar_lea.hbm %s5283_s9, 4096  ;;  %s4479_s15 = scalar_lea.hbm %s5339_s6, 8192 }
 0x7d7   : > { %p4476_p6 = scmp.ne.s32.totalorder %s5283_s9, %s4475_s13  ;;  %p4480_p0 = scmp.lt.u32.totalorder %s5283_s9, %s5339_s6 }
 0x7d8   : > { %p4481_p5 = scmp.lt.u32.totalorder %s4479_s15, %s4475_s13  ;;  %p4483_p7 = scmp.lt.u32.totalorder %s4475_s13, %s5283_s9 }
 0x7d9   : > { %p4477_p10 = pnand %p4476_p6, %p5358_p4 }
 0x7da   : > { %p4482_p9 = por %p4481_p5, %p4480_p0 }
 0x7db   : > { %p4478_p11 = pneg %p4477_p10 }
 0x7dc   : > { %p4484_p12 = por %p4483_p7, %p4482_p9 }
 0x7de   : > { %p4485_p13 = pnand %p4484_p12, %p4478_p11 }
 0x7e0   : > { %4488 = shalt.err (!%p4485_p13)
}
 0x7e1   : > { %s4550_s18 = smov 128   ;;  %s4551_s17 = smov 8  }
 0x7e2   : > { %4148 = dma.vmem_to_hbm [thread:$0]  (%p5358_p4), %s5285_s20, 4096, %s5283_s9, %s2690_s27, %s4550_s18, %s4550_s18, %s4551_s17  }
 0x7e3 PF: > { %s2718_s14 = sand.u32 1, %s4527_s21   ;;  %p5359_p1 = scmp.ne.s32.totalorder %s5349_s8, 0 }
 0x7e4   : > { %p5360_p3 = scmp.ge.s32.totalorder %s4539_s24, 2  ;;  %s2719_s29 = scalar_lea.sflag [#allocation4], %s2718_s14 }
 0x7e6   : > { %p4171_p2 = pnand %p5360_p3, %p5359_p1 }
 0x7e8   : > { %4522 = dma.done.wait (!%p4171_p2), %s2719_s29, 4096  }
 0x7e9   : > { %4524 = vsyncadd (!%p4171_p2), %s2719_s29, 4294963200  ;;  %p22_p8 = scmp.ge.s32.totalorder %s4754_s7, 4   ;;  %s5361_s21 = smov %s4531_s22 }
 0x7ea   : > { %s5362_s22 = smov %s4535_s23  ;;  %s5363_s23 = smov %s4766_s26 }
 0x7eb   : > { %s5364_s24 = smov %s4754_s7  ;;  %24 = sbr.rel (!%p22_p8) target bundleno = 8 (0x8), region = 114 }
 0x7f2   :  { %2724 = vsyncpa [#allocation3], 1 }
 0x7f3   :  { %2726 = vsyncpa [#allocation3 + $0x1], 1 }
 0x7f4   :  { %2727 = vsyncpa [#allocation6], 1 }
 0x7f5   :  { %2728 = vsyncpa [#allocation9], 1 }
 0x7f6   :  { %2729 = vsyncpa [#allocation12], 1 }
 0x7f7   :  { %2730 = vsyncpa [#allocation4], 1 }
 0x7f8   :  { %2732 = vsyncpa [#allocation4 + $0x1], 1 }

</bundles_post_ra>
